<compile_context>
chip_gen: v6e
topology: v6e:2x2x1
jax: 0.10.0
libtpu: 0.0.40
codegen_flags: <defaults>
</compile_context>

<pallas_src>
import functools

import jax
import jax.numpy as jnp
from jax.experimental import pallas as pl
from jax.experimental.pallas import tpu as pltpu

K_IN = 28 * 28          # 784 (== full last dim of x block -> (8,128) rule OK)
H = 512
N_OUT = 10
N_PAD = 128             # lane-dense padded output width
TB_MAX = 512            # max batch tile


def _cdiv(a, b):
    return (a + b - 1) // b


def _round_up(x, m):
    return (x + m - 1) // m * m


def mlp_kernel(x_ref, w1_ref, b1_ref, w2_ref, b2_ref, w3_ref, b3_ref, o_ref):
    # Layer 1: (TB, 784) bf16 @ (784, 512) bf16 -> f32, +bias, ReLU
    h1 = jnp.dot(x_ref[...], w1_ref[...], preferred_element_type=jnp.float32)
    h1 = jnp.maximum(h1 + b1_ref[...], 0.0).astype(jnp.bfloat16)
    # Layer 2: (TB, 512) bf16 @ (512, 512) bf16 -> f32, +bias, ReLU
    h2 = jnp.dot(h1, w2_ref[...], preferred_element_type=jnp.float32)
    h2 = jnp.maximum(h2 + b2_ref[...], 0.0).astype(jnp.bfloat16)
    # Layer 3: (TB, 512) bf16 @ (512, 128) bf16 -> f32, +bias (no activation)
    o_ref[...] = (
        jnp.dot(h2, w3_ref[...], preferred_element_type=jnp.float32) + b3_ref[...]
    )


@jax.jit
def neural_network_forward(x, params):
    """x: (B, 1, 28, 28) float32 NCHW. Returns logits (B, 10) float32."""
    w1, b1, w2, b2, w3, b3 = params
    B = x.shape[0]

    # nn.Flatten() + single bf16 cast (no K padding).
    x_flat = x.reshape(B, K_IN).astype(jnp.bfloat16)

    # Batch-tile policy:
    #  * large B: tiles of <= TB_MAX rows, ceil-div so padding waste < 8 rows
    #  * 256 <= B <= TB_MAX: split into 2 tiles so both v7x TCs get work
    #  * small B: a single 8-row-aligned tile (latency path, weight-DMA bound)
    if B > TB_MAX:
        n_tiles = _cdiv(B, TB_MAX)
    elif B >= 256:
        n_tiles = 2
    else:
        n_tiles = 1
    TB = max(8, _round_up(_cdiv(B, n_tiles), 8))
    B_pad = n_tiles * TB
    if B_pad != B:
        x_flat = jnp.pad(x_flat, ((0, B_pad - B), (0, 0)))

    # Weights: bf16 (MXU-native, halves weight DMA); biases f32.
    # W3/b3 columns zero-padded 10 -> 128 for a lane-dense, unmasked-vst output.
    w1p = w1.astype(jnp.bfloat16)
    w2p = w2.astype(jnp.bfloat16)
    w3p = jnp.pad(w3.astype(jnp.bfloat16), ((0, 0), (0, N_PAD - N_OUT)))
    b1p = b1.astype(jnp.float32)
    b2p = b2.astype(jnp.float32)
    b3p = jnp.pad(b3.astype(jnp.float32), ((0, 0), (0, N_PAD - N_OUT)))

    grid = (n_tiles,)
    # Constant index_map -> weight/bias blocks stay VMEM-resident across steps.
    resident = lambda shp: pl.BlockSpec(shp, lambda i: (0, 0))  # noqa: E731

    out = pl.pallas_call(
        mlp_kernel,
        out_shape=jax.ShapeDtypeStruct((B_pad, N_PAD), jnp.float32),
        grid=grid,
        in_specs=[
            pl.BlockSpec((TB, K_IN), lambda i: (i, 0)),    # x: tiled on batch
            resident((K_IN, H)),                           # w1
            resident((1, H)),                              # b1
            resident((H, H)),                              # w2
            resident((1, H)),                              # b2
            resident((H, N_PAD)),                          # w3
            resident((1, N_PAD)),                          # b3
        ],
        out_specs=pl.BlockSpec((TB, N_PAD), lambda i: (i, 0)),
        compiler_params=pltpu.CompilerParams(
            dimension_semantics=("parallel",),
            # Deliberate: ~8-10 MiB actual footprint at TB=512; 32 MiB leaves
            # headroom for larger tiles and fits every chip's physical VMEM.
            vmem_limit_bytes=32 << 20,
        ),
    )(x_flat, w1p, b1p, w2p, b2p, w3p, b3p)

    return out[:B, :N_OUT]


def init_params(key):
    """Deterministic init matching nn.Linear shapes (stored as (in, out)), f32."""
    ks = jax.random.split(key, 6)

    def linear(kw, kb, fan_in, fan_out):
        bound = 1.0 / jnp.sqrt(fan_in)
        w = jax.random.uniform(kw, (fan_in, fan_out), jnp.float32, -bound, bound)
        b = jax.random.uniform(kb, (1, fan_out), jnp.float32, -bound, bound)
        return w, b

    w1, b1 = linear(ks[0], ks[1], K_IN, H)
    w2, b2 = linear(ks[2], ks[3], H, H)
    w3, b3 = linear(ks[4], ks[5], H, N_OUT)
    return (w1, b1, w2, b2, w3, b3)


def reference_forward(x, params):
    """Pure-JAX reference using the same bf16-weight / f32-accumulate recipe."""
    w1, b1, w2, b2, w3, b3 = params
    xf = x.reshape(x.shape[0], K_IN).astype(jnp.bfloat16)
    h1 = jnp.dot(xf, w1.astype(jnp.bfloat16), preferred_element_type=jnp.float32)
    h1 = jnp.maximum(h1 + b1, 0.0).astype(jnp.bfloat16)
    h2 = jnp.dot(h1, w2.astype(jnp.bfloat16), preferred_element_type=jnp.float32)
    h2 = jnp.maximum(h2 + b2, 0.0).astype(jnp.bfloat16)
    return jnp.dot(h2, w3.astype(jnp.bfloat16), preferred_element_type=jnp.float32) + b3


if __name__ == "__main__":
    key = jax.random.PRNGKey(0)
    k_param, k_x = jax.random.split(key)

    params = init_params(k_param)
    # MNIST-like input: batch=8, NCHW (8, 1, 28, 28)
    x = jax.random.normal(k_x, (8, 1, 28, 28), jnp.float32)

    logits = neural_network_forward(x, params)
    jax.block_until_ready(logits)

    ref = reference_forward(x, params)
    assert logits.shape == (8, N_OUT), logits.shape
    assert jnp.allclose(logits, ref, atol=2e-3, rtol=2e-3), (
        float(jnp.max(jnp.abs(logits - ref)))
    )

    print("KERNEL_OK")
</pallas_src>

<mosaic_0001>
module attributes {stable_mosaic.version = 11 : i64} {
  func.func @mlp_kernel(%arg0: i32, %arg1: memref<8x784xbf16, #tpu.memory_space<vmem>>, %arg2: memref<784x512xbf16, #tpu.memory_space<vmem>>, %arg3: memref<1x512xf32, #tpu.memory_space<vmem>>, %arg4: memref<512x512xbf16, #tpu.memory_space<vmem>>, %arg5: memref<1x512xf32, #tpu.memory_space<vmem>>, %arg6: memref<512x128xbf16, #tpu.memory_space<vmem>>, %arg7: memref<1x128xf32, #tpu.memory_space<vmem>>, %arg8: memref<8x128xf32, #tpu.memory_space<vmem>>) attributes {dimension_semantics = [#tpu.dimension_semantics<parallel>], iteration_bounds = array<i64: 1>, scalar_prefetch = 0 : i64, scratch_operands = 0 : i64, tpu.core_type = #tpu.core_type<tc>, window_params = [{transform_indices = @transform_0, window_bounds = array<i64: 8, 784>}, {pipeline_mode = #tpu.pipeline_mode<synchronous>, transform_indices = @transform_1, window_bounds = array<i64: 784, 512>}, {pipeline_mode = #tpu.pipeline_mode<synchronous>, transform_indices = @transform_2, window_bounds = array<i64: 1, 512>}, {pipeline_mode = #tpu.pipeline_mode<synchronous>, transform_indices = @transform_3, window_bounds = array<i64: 512, 512>}, {pipeline_mode = #tpu.pipeline_mode<synchronous>, transform_indices = @transform_4, window_bounds = array<i64: 1, 512>}, {pipeline_mode = #tpu.pipeline_mode<synchronous>, transform_indices = @transform_5, window_bounds = array<i64: 512, 128>}, {pipeline_mode = #tpu.pipeline_mode<synchronous>, transform_indices = @transform_6, window_bounds = array<i64: 1, 128>}, {transform_indices = @transform_7, window_bounds = array<i64: 8, 128>}]} {
    %c0 = arith.constant 0 : index
    %c0_0 = arith.constant 0 : index
    %0 = vector.load %arg1[%c0, %c0_0] : memref<8x784xbf16, #tpu.memory_space<vmem>>, vector<8x784xbf16>
    %c0_1 = arith.constant 0 : index
    %c0_2 = arith.constant 0 : index
    %1 = vector.load %arg2[%c0_1, %c0_2] : memref<784x512xbf16, #tpu.memory_space<vmem>>, vector<784x512xbf16>
    %cst = arith.constant dense<0.000000e+00> : vector<8x512xf32>
    %2 = tpu.matmul %0, %1, %cst {dimension_numbers = #tpu.dot_dimension_numbers<[1], [0], [0], [1], [0, 0, 1, 1], [], []>} : vector<8x784xbf16>, vector<784x512xbf16>, vector<8x512xf32> -> vector<8x512xf32>
    %c0_3 = arith.constant 0 : index
    %c0_4 = arith.constant 0 : index
    %3 = vector.load %arg3[%c0_3, %c0_4] : memref<1x512xf32, #tpu.memory_space<vmem>>, vector<1x512xf32>
    %4 = vector.broadcast %3 : vector<1x512xf32> to vector<8x512xf32>
    %5 = arith.addf %2, %4 : vector<8x512xf32>
    %cst_5 = arith.constant 0.000000e+00 : f32
    %6 = vector.broadcast %cst_5 : f32 to vector<8x512xf32>
    %7 = arith.maximumf %5, %6 : vector<8x512xf32>
    %8 = arith.truncf %7 : vector<8x512xf32> to vector<8x512xbf16>
    %c0_6 = arith.constant 0 : index
    %c0_7 = arith.constant 0 : index
    %9 = vector.load %arg4[%c0_6, %c0_7] : memref<512x512xbf16, #tpu.memory_space<vmem>>, vector<512x512xbf16>
    %cst_8 = arith.constant dense<0.000000e+00> : vector<8x512xf32>
    %10 = tpu.matmul %8, %9, %cst_8 {dimension_numbers = #tpu.dot_dimension_numbers<[1], [0], [0], [1], [0, 0, 1, 1], [], []>} : vector<8x512xbf16>, vector<512x512xbf16>, vector<8x512xf32> -> vector<8x512xf32>
    %c0_9 = arith.constant 0 : index
    %c0_10 = arith.constant 0 : index
    %11 = vector.load %arg5[%c0_9, %c0_10] : memref<1x512xf32, #tpu.memory_space<vmem>>, vector<1x512xf32>
    %12 = vector.broadcast %11 : vector<1x512xf32> to vector<8x512xf32>
    %13 = arith.addf %10, %12 : vector<8x512xf32>
    %cst_11 = arith.constant 0.000000e+00 : f32
    %14 = vector.broadcast %cst_11 : f32 to vector<8x512xf32>
    %15 = arith.maximumf %13, %14 : vector<8x512xf32>
    %16 = arith.truncf %15 : vector<8x512xf32> to vector<8x512xbf16>
    %c0_12 = arith.constant 0 : index
    %c0_13 = arith.constant 0 : index
    %17 = vector.load %arg6[%c0_12, %c0_13] : memref<512x128xbf16, #tpu.memory_space<vmem>>, vector<512x128xbf16>
    %cst_14 = arith.constant dense<0.000000e+00> : vector<8x128xf32>
    %18 = tpu.matmul %16, %17, %cst_14 {dimension_numbers = #tpu.dot_dimension_numbers<[1], [0], [0], [1], [0, 0, 1, 1], [], []>} : vector<8x512xbf16>, vector<512x128xbf16>, vector<8x128xf32> -> vector<8x128xf32>
    %c0_15 = arith.constant 0 : index
    %c0_16 = arith.constant 0 : index
    %19 = vector.load %arg7[%c0_15, %c0_16] : memref<1x128xf32, #tpu.memory_space<vmem>>, vector<1x128xf32>
    %20 = vector.broadcast %19 : vector<1x128xf32> to vector<8x128xf32>
    %21 = arith.addf %18, %20 : vector<8x128xf32>
    %c0_17 = arith.constant 0 : index
    %c0_18 = arith.constant 0 : index
    %22 = vector.load %arg8[%c0_17, %c0_18] : memref<8x128xf32, #tpu.memory_space<vmem>>, vector<8x128xf32>
    tpu.vector_store %arg8[%c0_17, %c0_18], %21 {strides = array<i32>} : memref<8x128xf32, #tpu.memory_space<vmem>>, vector<8x128xf32>,
    return
  }
  func.func @transform_0(%arg0: i32) -> (i32, i32) {
    %c0_i32 = arith.constant 0 : i32
    %c0_i32_0 = arith.constant 0 : i32
    return %arg0, %c0_i32 : i32, i32
  }
  func.func @transform_1(%arg0: i32) -> (i32, i32) {
    %c0_i32 = arith.constant 0 : i32
    %c0_i32_0 = arith.constant 0 : i32
    %c0_i32_1 = arith.constant 0 : i32
    return %c0_i32, %c0_i32_0 : i32, i32
  }
  func.func @transform_2(%arg0: i32) -> (i32, i32) {
    %c0_i32 = arith.constant 0 : i32
    %c0_i32_0 = arith.constant 0 : i32
    %c0_i32_1 = arith.constant 0 : i32
    return %c0_i32, %c0_i32_0 : i32, i32
  }
  func.func @transform_3(%arg0: i32) -> (i32, i32) {
    %c0_i32 = arith.constant 0 : i32
    %c0_i32_0 = arith.constant 0 : i32
    %c0_i32_1 = arith.constant 0 : i32
    return %c0_i32, %c0_i32_0 : i32, i32
  }
  func.func @transform_4(%arg0: i32) -> (i32, i32) {
    %c0_i32 = arith.constant 0 : i32
    %c0_i32_0 = arith.constant 0 : i32
    %c0_i32_1 = arith.constant 0 : i32
    return %c0_i32, %c0_i32_0 : i32, i32
  }
  func.func @transform_5(%arg0: i32) -> (i32, i32) {
    %c0_i32 = arith.constant 0 : i32
    %c0_i32_0 = arith.constant 0 : i32
    %c0_i32_1 = arith.constant 0 : i32
    return %c0_i32, %c0_i32_0 : i32, i32
  }
  func.func @transform_6(%arg0: i32) -> (i32, i32) {
    %c0_i32 = arith.constant 0 : i32
    %c0_i32_0 = arith.constant 0 : i32
    %c0_i32_1 = arith.constant 0 : i32
    return %c0_i32, %c0_i32_0 : i32, i32
  }
  func.func @transform_7(%arg0: i32) -> (i32, i32) {
    %c0_i32 = arith.constant 0 : i32
    %c0_i32_0 = arith.constant 0 : i32
    return %arg0, %c0_i32 : i32, i32
  }
}

</mosaic_0001>

<bundles_post_ra>
// kernel: neural_network_forward.1
= control target key start
LH: loop header
LB: loop body
LE: loop exit
PB: predicated region body
PF: predicated region fallthrough
CT: control target
= control target key end

     0   :  { %vm1254_vm0 = vcmask 130048   ;;  %s5087_s0 = inlined_call_operand.vmem [shape: bf16[8,784], index: 0, kind: input, shape index: {}]   ;;  %s5088_s1 = inlined_call_operand.vmem [shape: bf16[784,512], index: 1, kind: input, shape index: {}]   ;;  %s5089_s2 = inlined_call_operand.vmem [shape: f32[1,512], index: 2, kind: input, shape index: {}]   ;;  %s5090_s3 = inlined_call_operand.vmem [shape: bf16[512,512], index: 3, kind: input, shape index: {}]   ;;  %s5091_s4 = inlined_call_operand.vmem [shape: f32[1,512], index: 4, kind: input, shape index: {}]   ;;  %s5092_s5 = inlined_call_operand.vmem [shape: bf16[512,128], index: 5, kind: input, shape index: {}]   ;;  %s5093_s6 = inlined_call_operand.vmem [shape: f32[1,128], index: 6, kind: input, shape index: {}]   ;;  %s5094_s7 = inlined_call_operand.hbm [shape: f32[8,128], index: 7, kind: output, shape index: {}]  }
   0x1   :  { %v3326_v0 = vld [vmem:[%s5088_s1 + $0xe4] ss:$16 sps:$4 sm:$0xff]   ;;  %v3330_v2 = vld [vmem:[%s5088_s1 + $0xe0] ss:$16 sps:$4 sm:$0xff]   ;;  %v29_v48 = vld [vmem:[%s5087_s0 + $0x8] sm:$0xff] }
   0x2   :  { %v3328_v1 = vld [vmem:[%s5088_s1 + $0x2e4] ss:$16 sps:$4 sm:$0xff]   ;;  %1258 = vmatprep.subr.bf16.mxu0 %v3326_v0  ;;  %v3331_v3 = vld [vmem:[%s5088_s1 + $0x2e0] ss:$16 sps:$4 sm:$0xff]   ;;  %v4068_v51 = vcombine.high %v29_v48, %v29_v48 }
   0x3   :  { %1299 = vmatprep.subr.bf16.mxu1 %v3328_v1  ;;  %v3332_v4 = vld [vmem:[%s5088_s1 + $0xc4] ss:$16 sps:$4 sm:$0xff]   ;;  %1259 = vmatpush1.bf16.msra.mxu0 %v3330_v2  ;;  %v3336_v6 = vld [vmem:[%s5088_s1 + $0xc0] ss:$16 sps:$4 sm:$0xff]  }
   0x4   :  { %1300 = vmatpush1.bf16.msra.mxu1 %v3331_v3  ;;  %v3334_v5 = vld [vmem:[%s5088_s1 + $0x2c4] ss:$16 sps:$4 sm:$0xff]   ;;  %1260 = vmatprep.subr.bf16.mxu0 %v3332_v4  ;;  %v3337_v7 = vld [vmem:[%s5088_s1 + $0x2c0] ss:$16 sps:$4 sm:$0xff]  }
   0x5   :  { %1301 = vmatprep.subr.bf16.mxu1 %v3334_v5  ;;  %v3338_v8 = vld [vmem:[%s5088_s1 + $0xa4] ss:$16 sps:$4 sm:$0xff]   ;;  %v3342_v10 = vld [vmem:[%s5088_s1 + $0xa0] ss:$16 sps:$4 sm:$0xff]   ;;  %1331 = vmatprep.mubr.bf16.mxu1 %v4068_v51 }
   0x6   :  { %v3340_v9 = vld [vmem:[%s5088_s1 + $0x2a4] ss:$16 sps:$4 sm:$0xff]   ;;  %v3343_v11 = vld [vmem:[%s5088_s1 + $0x2a0] ss:$16 sps:$4 sm:$0xff]  }
   0x7   :  { %1261 = vmatpush1.bf16.msra.mxu0 %v3336_v6  ;;  %v3344_v12 = vld [vmem:[%s5088_s1 + $0x84] ss:$16 sps:$4 sm:$0xff]   ;;  %v3348_v14 = vld [vmem:[%s5088_s1 + $0x80] ss:$16 sps:$4 sm:$0xff]  }
   0x8   :  { %1302 = vmatpush1.bf16.msra.mxu1 %v3337_v7  ;;  %1262 = vmatprep.subr.bf16.mxu0 %v3338_v8  ;;  %v3346_v13 = vld [vmem:[%s5088_s1 + $0x284] ss:$16 sps:$4 sm:$0xff]   ;;  %v3349_v15 = vld [vmem:[%s5088_s1 + $0x280] ss:$16 sps:$4 sm:$0xff]   ;;  %v4128_v7 = vcombine.low %v29_v48, %v29_v48  ;;  %v3486_v48 = vld [vmem:[%s5088_s1 + $0x1ec] ss:$16 sps:$4 sm:$0xff]  }
   0x9   :  { %1303 = vmatprep.subr.bf16.mxu1 %v3340_v9  ;;  %v3350_v16 = vld [vmem:[%s5088_s1 + $0x64] ss:$16 sps:$4 sm:$0xff]   ;;  %v3354_v18 = vld [vmem:[%s5088_s1 + $0x60] ss:$16 sps:$4 sm:$0xff]  }
   0xa   :  { %v3352_v17 = vld [vmem:[%s5088_s1 + $0x264] ss:$16 sps:$4 sm:$0xff]   ;;  %v3355_v19 = vld [vmem:[%s5088_s1 + $0x260] ss:$16 sps:$4 sm:$0xff]  }
   0xb   :  { %1263 = vmatpush1.bf16.msra.mxu0 %v3342_v10  ;;  %v3356_v20 = vld [vmem:[%s5088_s1 + $0x44] ss:$16 sps:$4 sm:$0xff]   ;;  %v3360_v22 = vld [vmem:[%s5088_s1 + $0x40] ss:$16 sps:$4 sm:$0xff]  }
   0xc   :  { %1304 = vmatpush1.bf16.msra.mxu1 %v3343_v11  ;;  %1264 = vmatprep.subr.bf16.mxu0 %v3344_v12  ;;  %v3358_v21 = vld [vmem:[%s5088_s1 + $0x244] ss:$16 sps:$4 sm:$0xff]   ;;  %v3361_v23 = vld [vmem:[%s5088_s1 + $0x240] ss:$16 sps:$4 sm:$0xff]   ;;  %v3437_v11 = vld [vmem:[%s5088_s1 + $0xec] ss:$16 sps:$4 sm:$0xff]  }
   0xd   :  { %1305 = vmatprep.subr.bf16.mxu1 %v3346_v13  ;;  %v3362_v24 = vld [vmem:[%s5088_s1 + $0x24] ss:$16 sps:$4 sm:$0xff]   ;;  %v3366_v26 = vld [vmem:[%s5088_s1 + $0x20] ss:$16 sps:$4 sm:$0xff]   ;;  %v3874_v13 = vmov 0  }
   0xe   :  { %v3364_v25 = vld [vmem:[%s5088_s1 + $0x224] ss:$16 sps:$4 sm:$0xff]   ;;  %v3367_v27 = vld [vmem:[%s5088_s1 + $0x220] ss:$16 sps:$4 sm:$0xff]  }
   0xf   :  { %1265 = vmatpush1.bf16.msra.mxu0 %v3348_v14  ;;  %v3368_v28 = vld [vmem:[%s5088_s1 + $0x4] ss:$16 sps:$4 sm:$0xff]   ;;  %v3372_v30 = vld [vmem:[%s5088_s1] ss:$16 sps:$4 sm:$0xff]  }
  0x10   :  { %1306 = vmatpush1.bf16.msra.mxu1 %v3349_v15  ;;  %1266 = vmatprep.subr.bf16.mxu0 %v3350_v16  ;;  %v3370_v29 = vld [vmem:[%s5088_s1 + $0x204] ss:$16 sps:$4 sm:$0xff]   ;;  %v3373_v31 = vld [vmem:[%s5088_s1 + $0x200] ss:$16 sps:$4 sm:$0xff]   ;;  %v3435_v15 = vld [vmem:[%s5088_s1 + $0xe8] ss:$16 sps:$4 sm:$0xff]  }
  0x11   :  { %1307 = vmatprep.subr.bf16.mxu1 %v3352_v17  ;;  %v3374_v32 = vld [vmem:[%s5088_s1 + $0x1e4] ss:$16 sps:$4 sm:$0xff]   ;;  %v3378_v34 = vld [vmem:[%s5088_s1 + $0x1e0] ss:$16 sps:$4 sm:$0xff]   ;;  %v3441_v17 = vld [vmem:[%s5087_s0 + $0x18] ss:$0 sps:$4 sm:$0xff]  }
  0x12   :  { %v3376_v33 = vld [vmem:[%s5088_s1 + $0x3e4] ss:$16 sps:$4 sm:$0xff]   ;;  %v3379_v35 = vld [vmem:[%s5088_s1 + $0x3e0] ss:$16 sps:$4 sm:$0xff]  }
  0x13   :  { %1267 = vmatpush1.bf16.msra.mxu0 %v3354_v18  ;;  %v3380_v36 = vld [vmem:[%s5088_s1 + $0x1c4] ss:$16 sps:$4 sm:$0xff]   ;;  %v3384_v38 = vld [vmem:[%s5088_s1 + $0x1c0] ss:$16 sps:$4 sm:$0xff]   ;;  %v3444_v18 = vld [vmem:[%s5088_s1 + $0xcc] ss:$16 sps:$4 sm:$0xff]  }
  0x14   :  { %1308 = vmatpush1.bf16.msra.mxu1 %v3355_v19  ;;  %1268 = vmatprep.subr.bf16.mxu0 %v3356_v20  ;;  %v3382_v37 = vld [vmem:[%s5088_s1 + $0x3c4] ss:$16 sps:$4 sm:$0xff]   ;;  %v3385_v39 = vld [vmem:[%s5088_s1 + $0x3c0] ss:$16 sps:$4 sm:$0xff]   ;;  %v3442_v20 = vld [vmem:[%s5088_s1 + $0xc8] ss:$16 sps:$4 sm:$0xff]  }
  0x15   :  { %1309 = vmatprep.subr.bf16.mxu1 %v3358_v21  ;;  %v3386_v40 = vld [vmem:[%s5088_s1 + $0x1a4] ss:$16 sps:$4 sm:$0xff]   ;;  %v3390_v42 = vld [vmem:[%s5088_s1 + $0x1a0] ss:$16 sps:$4 sm:$0xff]  }
  0x16   :  { %v3388_v41 = vld [vmem:[%s5088_s1 + $0x3a4] ss:$16 sps:$4 sm:$0xff]   ;;  %v3391_v43 = vld [vmem:[%s5088_s1 + $0x3a0] ss:$16 sps:$4 sm:$0xff]  }
  0x17   :  { %1269 = vmatpush1.bf16.msra.mxu0 %v3360_v22  ;;  %v3392_v44 = vld [vmem:[%s5088_s1 + $0x184] ss:$16 sps:$4 sm:$0xff]   ;;  %v3396_v49 = vld [vmem:[%s5088_s1 + $0x180] ss:$16 sps:$4 sm:$0xff]   ;;  %v3450_v22 = vld [vmem:[%s5088_s1 + $0xac] ss:$16 sps:$4 sm:$0xff]  }
  0x18   :  { %1310 = vmatpush1.bf16.msra.mxu1 %v3361_v23  ;;  %1270 = vmatprep.subr.bf16.mxu0 %v3362_v24  ;;  %v3394_v45 = vld [vmem:[%s5088_s1 + $0x384] ss:$16 sps:$4 sm:$0xff]   ;;  %v3397_v50 = vld [vmem:[%s5088_s1 + $0x380] ss:$16 sps:$4 sm:$0xff]   ;;  %v3448_v24 = vld [vmem:[%s5088_s1 + $0xa8] ss:$16 sps:$4 sm:$0xff]  }
  0x19   :  { %1311 = vmatprep.subr.bf16.mxu1 %v3364_v25  ;;  %v28_v46 = vld [vmem:[%s5087_s0] sm:$0xff] }
  0x1a   :  { %v4057_v47 = vcombine.high %v28_v46, %v28_v46  ;;  %v3398_v52 = vld [vmem:[%s5088_s1 + $0x164] ss:$16 sps:$4 sm:$0xff]   ;;  %v3402_v54 = vld [vmem:[%s5088_s1 + $0x160] ss:$16 sps:$4 sm:$0xff]   ;;  %v4126_v6 = vcombine.low %v28_v46, %v28_v46  ;;  %v3478_v46 = vld [vmem:[%s5088_s1 + $0x8] ss:$16 sps:$4 sm:$0xff]  }
  0x1b   :  { %1271 = vmatpush1.bf16.msra.mxu0 %v3366_v26  ;;  %v3400_v53 = vld [vmem:[%s5088_s1 + $0x364] ss:$16 sps:$4 sm:$0xff]   ;;  %v3403_v55 = vld [vmem:[%s5088_s1 + $0x360] ss:$16 sps:$4 sm:$0xff]   ;;  %v3456_v26 = vld [vmem:[%s5088_s1 + $0x8c] ss:$16 sps:$4 sm:$0xff]  }
  0x1c   :  { %1312 = vmatpush1.bf16.msra.mxu1 %v3367_v27  ;;  %1272 = vmatprep.subr.bf16.mxu0 %v3368_v28  ;;  %v3404_v56 = vld [vmem:[%s5088_s1 + $0x144] ss:$16 sps:$4 sm:$0xff]   ;;  %v3408_v58 = vld [vmem:[%s5088_s1 + $0x140] ss:$16 sps:$4 sm:$0xff]   ;;  %v3454_v28 = vld [vmem:[%s5088_s1 + $0x88] ss:$16 sps:$4 sm:$0xff]  }
  0x1d   :  { %1313 = vmatprep.subr.bf16.mxu1 %v3370_v29  ;;  %1290 = vmatprep.mubr.bf16.mxu0 %v4057_v47  ;;  %v3406_v57 = vld [vmem:[%s5088_s1 + $0x344] ss:$16 sps:$4 sm:$0xff]   ;;  %v3409_v59 = vld [vmem:[%s5088_s1 + $0x340] ss:$16 sps:$4 sm:$0xff]  }
  0x1e   :  { %v3410_v60 = vld [vmem:[%s5088_s1 + $0x124] ss:$16 sps:$4 sm:$0xff]   ;;  %v3414_v62 = vld [vmem:[%s5088_s1 + $0x120] ss:$16 sps:$4 sm:$0xff]  }
  0x1f   :  { %1273 = vmatpush1.bf16.msra.mxu0 %v3372_v30  ;;  %v3412_v61 = vld [vmem:[%s5088_s1 + $0x324] ss:$16 sps:$4 sm:$0xff]   ;;  %v3415_v63 = vld [vmem:[%s5088_s1 + $0x320] ss:$16 sps:$4 sm:$0xff]   ;;  %v3462_v30 = vld [vmem:[%s5088_s1 + $0x6c] ss:$16 sps:$4 sm:$0xff]  }
  0x20   :  { %1314 = vmatpush1.bf16.msra.mxu1 %v3373_v31  ;;  %1274 = vmatprep.subr.bf16.mxu0 %v3374_v32  ;;  %v3416_v0 = vld [vmem:[%s5088_s1 + $0x104] ss:$16 sps:$4 sm:$0xff]   ;;  %v3420_v2 = vld [vmem:[%s5088_s1 + $0x100] ss:$16 sps:$4 sm:$0xff]  }
  0x21   :  { %1315 = vmatprep.subr.bf16.mxu1 %v3376_v33  ;;  %v3418_v1 = vld [vmem:[%s5088_s1 + $0x304] ss:$16 sps:$4 sm:$0xff]   ;;  %v3421_v3 = vld [vmem:[%s5088_s1 + $0x300] ss:$16 sps:$4 sm:$0xff]  }
  0x22   :  { %v3428_v4 = vld [vmem:[%s5088_s1 + $0x4e4] ss:$16 sps:$4 sm:$0xff]   ;;  %v3426_v8 = vld [vmem:[%s5088_s1 + $0x4e0] ss:$16 sps:$4 sm:$0xff]  }
  0x23   :  { %1275 = vmatpush2.bf16.msra.mxu0 %v3378_v34  ;;  %v3431_v5 = vld [vmem:[%s5088_s1 + $0x604] ss:$16 sps:$4 sm:$0xff]   ;;  %v3429_v9 = vld [vmem:[%s5088_s1 + $0x600] ss:$16 sps:$4 sm:$0xff]   ;;  %v3460_v34 = vld [vmem:[%s5088_s1 + $0x68] ss:$16 sps:$4 sm:$0xff]  }
  0x24   :  { %1316 = vmatpush2.bf16.msra.mxu1 %v3379_v35  ;;  %1276 = vmatprep.subr.bf16.mxu0 %v3380_v36  ;;  %v3434_v10 = vld [vmem:[%s5088_s1 + $0x4c4] ss:$16 sps:$4 sm:$0xff]   ;;  %v3432_v12 = vld [vmem:[%s5088_s1 + $0x4c0] ss:$16 sps:$4 sm:$0xff]   ;;  %v3468_v36 = vld [vmem:[%s5088_s1 + $0x4c] ss:$16 sps:$4 sm:$0xff]  }
  0x25   :  { %1317 = vmatprep.subr.bf16.mxu1 %v3382_v37  ;;  %v3440_v14 = vld [vmem:[%s5088_s1 + $0x4a4] ss:$16 sps:$4 sm:$0xff]   ;;  %v3438_v16 = vld [vmem:[%s5088_s1 + $0x4a0] ss:$16 sps:$4 sm:$0xff]  }
  0x26   :  { %v3447_v19 = vld [vmem:[%s5088_s1 + $0x484] ss:$16 sps:$4 sm:$0xff]   ;;  %v3445_v21 = vld [vmem:[%s5088_s1 + $0x480] ss:$16 sps:$4 sm:$0xff]  }
  0x27   :  { %1277 = vmatpush2.bf16.msra.mxu0 %v3384_v38  ;;  %v3453_v23 = vld [vmem:[%s5088_s1 + $0x464] ss:$16 sps:$4 sm:$0xff]   ;;  %v3451_v25 = vld [vmem:[%s5088_s1 + $0x460] ss:$16 sps:$4 sm:$0xff]   ;;  %v3466_v38 = vld [vmem:[%s5088_s1 + $0x48] ss:$16 sps:$4 sm:$0xff]  }
  0x28   :  { %1318 = vmatpush2.bf16.msra.mxu1 %v3385_v39  ;;  %1278 = vmatprep.subr.bf16.mxu0 %v3386_v40  ;;  %v3459_v27 = vld [vmem:[%s5088_s1 + $0x444] ss:$16 sps:$4 sm:$0xff]   ;;  %v3457_v29 = vld [vmem:[%s5088_s1 + $0x440] ss:$16 sps:$4 sm:$0xff]   ;;  %v3474_v40 = vld [vmem:[%s5088_s1 + $0x2c] ss:$16 sps:$4 sm:$0xff]  }
  0x29   :  { %1319 = vmatprep.subr.bf16.mxu1 %v3388_v41  ;;  %v3465_v31 = vld [vmem:[%s5088_s1 + $0x424] ss:$16 sps:$4 sm:$0xff]   ;;  %v3463_v35 = vld [vmem:[%s5088_s1 + $0x420] ss:$16 sps:$4 sm:$0xff]  }
  0x2a   :  { %v4207_v32 = vld [vmem:[%s5087_s0 + $0x10] sm:$0xff] }
  0x2b   :  { %1279 = vmatpush2.bf16.msra.mxu0 %v3390_v42  ;;  %v4211_v33 = vcombine.high %v4207_v32, %v4207_v32  ;;  %v3471_v37 = vld [vmem:[%s5088_s1 + $0x404] ss:$16 sps:$4 sm:$0xff]   ;;  %v3469_v39 = vld [vmem:[%s5088_s1 + $0x400] ss:$16 sps:$4 sm:$0xff]   ;;  %v3472_v42 = vld [vmem:[%s5088_s1 + $0x28] ss:$16 sps:$4 sm:$0xff]  }
  0x2c   :  { %1320 = vmatpush2.bf16.msra.mxu1 %v3391_v43  ;;  %1280 = vmatprep.subr.bf16.mxu0 %v3392_v44  ;;  %v3477_v41 = vld [vmem:[%s5088_s1 + $0x5e4] ss:$16 sps:$4 sm:$0xff]   ;;  %v3475_v43 = vld [vmem:[%s5088_s1 + $0x5e0] ss:$16 sps:$4 sm:$0xff]   ;;  %v3480_v44 = vld [vmem:[%s5088_s1 + $0xc] ss:$16 sps:$4 sm:$0xff]  }
  0x2d   :  { %1321 = vmatprep.subr.bf16.mxu1 %v3394_v45  ;;  %v3483_v45 = vld [vmem:[%s5088_s1 + $0x5c4] ss:$16 sps:$4 sm:$0xff]  }
  0x2f   :  { %1281 = vmatpush2.bf16.msra.mxu0 %v3396_v49  ;;  %v3489_v49 = vld [vmem:[%s5088_s1 + $0x5a4] ss:$16 sps:$4 sm:$0xff]  }
  0x30   :  { %1322 = vmatpush2.bf16.msra.mxu1 %v3397_v50  ;;  %1282 = vmatprep.subr.bf16.mxu0 %v3398_v52  ;;  %v3484_v50 = vld [vmem:[%s5088_s1 + $0x1e8] ss:$16 sps:$4 sm:$0xff]   ;;  %v3487_v52 = vld [vmem:[%s5088_s1 + $0x5a0] ss:$16 sps:$4 sm:$0xff]  }
  0x31   :  { %1323 = vmatprep.subr.bf16.mxu1 %v3400_v53  ;;  %v3492_v53 = vld [vmem:[%s5088_s1 + $0x1cc] ss:$16 sps:$4 sm:$0xff]  }
  0x33   :  { %1283 = vmatpush2.bf16.msra.mxu0 %v3402_v54  ;;  %v3495_v54 = vld [vmem:[%s5088_s1 + $0x584] ss:$16 sps:$4 sm:$0xff]  }
  0x34   :  { %1324 = vmatpush2.bf16.msra.mxu1 %v3403_v55  ;;  %1284 = vmatprep.subr.bf16.mxu0 %v3404_v56  ;;  %v3490_v55 = vld [vmem:[%s5088_s1 + $0x1c8] ss:$16 sps:$4 sm:$0xff]   ;;  %v3493_v56 = vld [vmem:[%s5088_s1 + $0x580] ss:$16 sps:$4 sm:$0xff]  }
  0x35   :  { %1325 = vmatprep.subr.bf16.mxu1 %v3406_v57  ;;  %v3498_v57 = vld [vmem:[%s5088_s1 + $0x1ac] ss:$16 sps:$4 sm:$0xff]  }
  0x37   :  { %1285 = vmatpush2.bf16.msra.mxu0 %v3408_v58  ;;  %v3501_v58 = vld [vmem:[%s5088_s1 + $0x564] ss:$16 sps:$4 sm:$0xff]  }
  0x38   :  { %1326 = vmatpush2.bf16.msra.mxu1 %v3409_v59  ;;  %1286 = vmatprep.subr.bf16.mxu0 %v3410_v60  ;;  %v3496_v59 = vld [vmem:[%s5088_s1 + $0x1a8] ss:$16 sps:$4 sm:$0xff]   ;;  %v3499_v60 = vld [vmem:[%s5088_s1 + $0x560] ss:$16 sps:$4 sm:$0xff]  }
  0x39   :  { %1327 = vmatprep.subr.bf16.mxu1 %v3412_v61  ;;  %v3504_v61 = vld [vmem:[%s5088_s1 + $0x18c] ss:$16 sps:$4 sm:$0xff]  }
  0x3b   :  { %1287 = vmatpush2.bf16.msra.mxu0 %v3414_v62  ;;  %v3507_v62 = vld [vmem:[%s5088_s1 + $0x544] ss:$16 sps:$4 sm:$0xff]  }
  0x3c   :  { %1328 = vmatpush2.bf16.msra.mxu1 %v3415_v63  ;;  %1288 = vmatprep.subr.bf16.mxu0 %v3416_v0  ;;  %v3502_v63 = vld [vmem:[%s5088_s1 + $0x188] ss:$16 sps:$4 sm:$0xff]   ;;  %v3505_v0 = vld [vmem:[%s5088_s1 + $0x540] ss:$16 sps:$4 sm:$0xff]  }
  0x3d   :  { %1329 = vmatprep.subr.bf16.mxu1 %v3418_v1  ;;  %v3510_v1 = vld [vmem:[%s5088_s1 + $0x16c] ss:$16 sps:$4 sm:$0xff]  }
  0x3f   :  { %1289 = vmatpush2.bf16.msra.mxu0 %v3420_v2  ;;  %v3513_v2 = vld [vmem:[%s5088_s1 + $0x524] ss:$16 sps:$4 sm:$0xff]  }
  0x40   :  { %1330 = vmatpush2.bf16.msra.mxu1 %v3421_v3  ;;  %1340 = vmatprep.subr.bf16.mxu0 %v3428_v4  ;;  %v3508_v3 = vld [vmem:[%s5088_s1 + $0x168] ss:$16 sps:$4 sm:$0xff]   ;;  %v3511_v4 = vld [vmem:[%s5088_s1 + $0x520] ss:$16 sps:$4 sm:$0xff]  }
  0x41   :  { %1395 = vmatprep.subr.bf16.mxu1 %v3431_v5  ;;  %v3516_v5 = vld [vmem:[%s5088_s1 + $0x14c] ss:$16 sps:$4 sm:$0xff]  }
  0x42   :  { %1291 = vmatmul.mubr.bf16.vlgmr.msra.gmra.mxu0 %v4126_v6 }
  0x43   :  { %1332 = vmatmul.mubr.bf16.vlgmr.msra.gmra.mxu1 %v4128_v7  ;;  %1341 = vmatpush1.bf16.msra.mxu0 %v3426_v8  ;;  %v3519_v8 = vld [vmem:[%s5088_s1 + $0x504] ss:$16 sps:$4 sm:$0xff]  }
  0x44   :  { %1396 = vmatpush1.bf16.msra.mxu1 %v3429_v9  ;;  %1342 = vmatprep.subr.bf16.mxu0 %v3434_v10  ;;  %v3514_v9 = vld [vmem:[%s5088_s1 + $0x148] ss:$16 sps:$4 sm:$0xff]   ;;  %v3517_v10 = vld [vmem:[%s5088_s1 + $0x500] ss:$16 sps:$4 sm:$0xff]  }
  0x45   :  { %1413 = vmatprep.mubr.bf16.mxu1 %v3874_v13  ;;  %1422 = vmatprep.subr.bf16.mxu1 %v3437_v11  ;;  %v3524_v11 = vld [vmem:[%s5088_s1 + $0x12c] ss:$16 sps:$4 sm:$0xff]  }
  0x46   :  { %1372 = vmatprep.mubr.bf16.mxu0 %v4211_v33 }
  0x47   :  { %1343 = vmatpush1.bf16.msra.mxu0 %v3432_v12  ;;  %v3527_v12 = vld [vmem:[%s5088_s1 + $0x2ec] ss:$16 sps:$4 sm:$0xff]  }
  0x48   :  { %1344 = vmatprep.subr.bf16.mxu0 %v3440_v14  ;;  %v4336_v14 = vcombine.low %v4207_v32, %v4207_v32  ;;  %v3557_v32 = vld [vmem:[%s5088_s1 + $0x24c] ss:$16 sps:$4 sm:$0xff]  }
  0x4b   :  { %3117 = vmatmul.mubr.msk.bf16.vlgmr.msra.gmra.mxu1 %vm1254_vm0, %v3441_v17  ;;  %1345 = vmatpush1.bf16.msra.mxu0 %v3438_v16  ;;  %v3525_v16 = vld [vmem:[%s5088_s1 + $0x2e8] ss:$16 sps:$4 sm:$0xff]   ;;  %v3530_v17 = vld [vmem:[%s5088_s1 + $0x10c] ss:$16 sps:$4 sm:$0xff]  }
  0x4c   :  { %1423 = vmatpush1.bf16.msra.mxu1 %v3435_v15  ;;  %1346 = vmatprep.subr.bf16.mxu0 %v3447_v19  ;;  %v3522_v15 = vld [vmem:[%s5088_s1 + $0x128] ss:$16 sps:$4 sm:$0xff]  }
  0x4d   :  { %1424 = vmatprep.subr.bf16.mxu1 %v3444_v18  ;;  %1454 = vmatprep.mubr.bf16.mxu1 %v4057_v47  ;;  %v3481_v47 = vld [vmem:[%s5088_s1 + $0x5c0] ss:$16 sps:$4 sm:$0xff]   ;;  %v3533_v18 = vld [vmem:[%s5088_s1 + $0x2cc] ss:$16 sps:$4 sm:$0xff]   ;;  %v3528_v19 = vld [vmem:[%s5088_s1 + $0x108] ss:$16 sps:$4 sm:$0xff]  }
  0x4f   :  { %1347 = vmatpush1.bf16.msra.mxu0 %v3445_v21  ;;  %v3536_v21 = vld [vmem:[%s5088_s1 + $0x4ec] ss:$16 sps:$4 sm:$0xff]  }
  0x50   :  { %1425 = vmatpush1.bf16.msra.mxu1 %v3442_v20  ;;  %1348 = vmatprep.subr.bf16.mxu0 %v3453_v23  ;;  %v3531_v20 = vld [vmem:[%s5088_s1 + $0x2c8] ss:$16 sps:$4 sm:$0xff]  }
  0x51   :  { %1426 = vmatprep.subr.bf16.mxu1 %v3450_v22  ;;  %v3539_v22 = vld [vmem:[%s5088_s1 + $0x2ac] ss:$16 sps:$4 sm:$0xff]   ;;  %v3534_v23 = vld [vmem:[%s5088_s1 + $0x4e8] ss:$16 sps:$4 sm:$0xff]  }
  0x53   :  { %1349 = vmatpush1.bf16.msra.mxu0 %v3451_v25  ;;  %v3542_v25 = vld [vmem:[%s5088_s1 + $0x4cc] ss:$16 sps:$4 sm:$0xff]  }
  0x54   :  { %1427 = vmatpush1.bf16.msra.mxu1 %v3448_v24  ;;  %1350 = vmatprep.subr.bf16.mxu0 %v3459_v27  ;;  %v3537_v24 = vld [vmem:[%s5088_s1 + $0x2a8] ss:$16 sps:$4 sm:$0xff]  }
  0x55   :  { %1428 = vmatprep.subr.bf16.mxu1 %v3456_v26  ;;  %v3545_v26 = vld [vmem:[%s5088_s1 + $0x28c] ss:$16 sps:$4 sm:$0xff]   ;;  %v3540_v27 = vld [vmem:[%s5088_s1 + $0x4c8] ss:$16 sps:$4 sm:$0xff]  }
  0x57   :  { %1351 = vmatpush1.bf16.msra.mxu0 %v3457_v29  ;;  %v3551_v29 = vld [vmem:[%s5088_s1 + $0x26c] ss:$16 sps:$4 sm:$0xff]  }
  0x58   :  { %1429 = vmatpush1.bf16.msra.mxu1 %v3454_v28  ;;  %1352 = vmatprep.subr.bf16.mxu0 %v3465_v31  ;;  %v3548_v28 = vld [vmem:[%s5088_s1 + $0x4ac] ss:$16 sps:$4 sm:$0xff]  }
  0x59   :  { %1430 = vmatprep.subr.bf16.mxu1 %v3462_v30  ;;  %v3546_v30 = vld [vmem:[%s5088_s1 + $0x4a8] ss:$16 sps:$4 sm:$0xff]   ;;  %v3554_v31 = vld [vmem:[%s5088_s1 + $0x48c] ss:$16 sps:$4 sm:$0xff]  }
  0x5b   :  { %1353 = vmatpush1.bf16.msra.mxu0 %v3463_v35  ;;  %v3560_v35 = vld [vmem:[%s5088_s1 + $0x46c] ss:$16 sps:$4 sm:$0xff]  }
  0x5c   :  { %1431 = vmatpush1.bf16.msra.mxu1 %v3460_v34  ;;  %1354 = vmatprep.subr.bf16.mxu0 %v3471_v37  ;;  %v3552_v34 = vld [vmem:[%s5088_s1 + $0x488] ss:$16 sps:$4 sm:$0xff]  }
  0x5d   :  { %1432 = vmatprep.subr.bf16.mxu1 %v3468_v36  ;;  %v3563_v36 = vld [vmem:[%s5088_s1 + $0x22c] ss:$16 sps:$4 sm:$0xff]   ;;  %v3558_v37 = vld [vmem:[%s5088_s1 + $0x468] ss:$16 sps:$4 sm:$0xff]  }
  0x5f   :  { %1355 = vmatpush1.bf16.msra.mxu0 %v3469_v39  ;;  %v3566_v39 = vld [vmem:[%s5088_s1 + $0x44c] ss:$16 sps:$4 sm:$0xff]  }
  0x60   :  { %1433 = vmatpush1.bf16.msra.mxu1 %v3466_v38  ;;  %1356 = vmatprep.subr.bf16.mxu0 %v3477_v41  ;;  %v3561_v38 = vld [vmem:[%s5088_s1 + $0x228] ss:$16 sps:$4 sm:$0xff]  }
  0x61   :  { %1434 = vmatprep.subr.bf16.mxu1 %v3474_v40  ;;  %v3569_v40 = vld [vmem:[%s5088_s1 + $0x20c] ss:$16 sps:$4 sm:$0xff]   ;;  %v3564_v41 = vld [vmem:[%s5088_s1 + $0x448] ss:$16 sps:$4 sm:$0xff]  }
  0x63   :  { %1357 = vmatpush2.bf16.msra.mxu0 %v3475_v43  ;;  %v3572_v43 = vld [vmem:[%s5088_s1 + $0x42c] ss:$16 sps:$4 sm:$0xff]  }
  0x64   :  { %1435 = vmatpush1.bf16.msra.mxu1 %v3472_v42  ;;  %1358 = vmatprep.subr.bf16.mxu0 %v3483_v45  ;;  %v3567_v42 = vld [vmem:[%s5088_s1 + $0x208] ss:$16 sps:$4 sm:$0xff]  }
  0x65   :  { %1436 = vmatprep.subr.bf16.mxu1 %v3480_v44  ;;  %v3575_v44 = vld [vmem:[%s5088_s1 + $0x3ec] ss:$16 sps:$4 sm:$0xff]   ;;  %v3570_v45 = vld [vmem:[%s5088_s1 + $0x428] ss:$16 sps:$4 sm:$0xff]  }
  0x67   :  { %1359 = vmatpush2.bf16.msra.mxu0 %v3481_v47  ;;  %v3578_v47 = vld [vmem:[%s5088_s1 + $0x40c] ss:$16 sps:$4 sm:$0xff]  }
  0x68   :  { %1437 = vmatpush1.bf16.msra.mxu1 %v3478_v46  ;;  %1360 = vmatprep.subr.bf16.mxu0 %v3489_v49  ;;  %v3573_v46 = vld [vmem:[%s5088_s1 + $0x3e8] ss:$16 sps:$4 sm:$0xff]  }
  0x69   :  { %1438 = vmatprep.subr.bf16.mxu1 %v3486_v48  ;;  %v3581_v48 = vld [vmem:[%s5088_s1 + $0x3cc] ss:$16 sps:$4 sm:$0xff]   ;;  %v3576_v49 = vld [vmem:[%s5088_s1 + $0x408] ss:$16 sps:$4 sm:$0xff]  }
  0x6b   :  { %1361 = vmatpush2.bf16.msra.mxu0 %v3487_v52  ;;  %v3584_v52 = vld [vmem:[%s5088_s1 + $0x5ec] ss:$16 sps:$4 sm:$0xff]  }
  0x6c   :  { %1439 = vmatpush2.bf16.msra.mxu1 %v3484_v50  ;;  %1362 = vmatprep.subr.bf16.mxu0 %v3495_v54  ;;  %v3579_v50 = vld [vmem:[%s5088_s1 + $0x3c8] ss:$16 sps:$4 sm:$0xff]  }
  0x6d   :  { %1440 = vmatprep.subr.bf16.mxu1 %v3492_v53  ;;  %v3587_v53 = vld [vmem:[%s5088_s1 + $0x3ac] ss:$16 sps:$4 sm:$0xff]   ;;  %v3582_v54 = vld [vmem:[%s5088_s1 + $0x5e8] ss:$16 sps:$4 sm:$0xff]  }
  0x6f   :  { %1363 = vmatpush2.bf16.msra.mxu0 %v3493_v56  ;;  %v3590_v56 = vld [vmem:[%s5088_s1 + $0x5cc] ss:$16 sps:$4 sm:$0xff]  }
  0x70   :  { %1441 = vmatpush2.bf16.msra.mxu1 %v3490_v55  ;;  %1364 = vmatprep.subr.bf16.mxu0 %v3501_v58  ;;  %v3585_v55 = vld [vmem:[%s5088_s1 + $0x3a8] ss:$16 sps:$4 sm:$0xff]  }
  0x71   :  { %1442 = vmatprep.subr.bf16.mxu1 %v3498_v57  ;;  %v3593_v57 = vld [vmem:[%s5088_s1 + $0x38c] ss:$16 sps:$4 sm:$0xff]   ;;  %v3588_v58 = vld [vmem:[%s5088_s1 + $0x5c8] ss:$16 sps:$4 sm:$0xff]  }
  0x73   :  { %1365 = vmatpush2.bf16.msra.mxu0 %v3499_v60  ;;  %v3596_v60 = vld [vmem:[%s5088_s1 + $0x5ac] ss:$16 sps:$4 sm:$0xff]  }
  0x74   :  { %1443 = vmatpush2.bf16.msra.mxu1 %v3496_v59  ;;  %1366 = vmatprep.subr.bf16.mxu0 %v3507_v62  ;;  %v3591_v59 = vld [vmem:[%s5088_s1 + $0x388] ss:$16 sps:$4 sm:$0xff]  }
  0x75   :  { %1444 = vmatprep.subr.bf16.mxu1 %v3504_v61  ;;  %v3599_v61 = vld [vmem:[%s5088_s1 + $0x36c] ss:$16 sps:$4 sm:$0xff]   ;;  %v3594_v62 = vld [vmem:[%s5088_s1 + $0x5a8] ss:$16 sps:$4 sm:$0xff]  }
  0x77   :  { %1367 = vmatpush2.bf16.msra.mxu0 %v3505_v0  ;;  %v3602_v0 = vld [vmem:[%s5088_s1 + $0x58c] ss:$16 sps:$4 sm:$0xff]  }
  0x78   :  { %1445 = vmatpush2.bf16.msra.mxu1 %v3502_v63  ;;  %1368 = vmatprep.subr.bf16.mxu0 %v3513_v2  ;;  %v3597_v63 = vld [vmem:[%s5088_s1 + $0x368] ss:$16 sps:$4 sm:$0xff]  }
  0x79   :  { %1446 = vmatprep.subr.bf16.mxu1 %v3510_v1  ;;  %v3605_v1 = vld [vmem:[%s5088_s1 + $0x34c] ss:$16 sps:$4 sm:$0xff]   ;;  %v3600_v2 = vld [vmem:[%s5088_s1 + $0x588] ss:$16 sps:$4 sm:$0xff]  }
  0x7b   :  { %1369 = vmatpush2.bf16.msra.mxu0 %v3511_v4  ;;  %v3608_v4 = vld [vmem:[%s5088_s1 + $0x56c] ss:$16 sps:$4 sm:$0xff]  }
  0x7c   :  { %1447 = vmatpush2.bf16.msra.mxu1 %v3508_v3  ;;  %1370 = vmatprep.subr.bf16.mxu0 %v3519_v8  ;;  %v3603_v3 = vld [vmem:[%s5088_s1 + $0x348] ss:$16 sps:$4 sm:$0xff]  }
  0x7d   :  { %1448 = vmatprep.subr.bf16.mxu1 %v3516_v5  ;;  %v3611_v5 = vld [vmem:[%s5088_s1 + $0x32c] ss:$16 sps:$4 sm:$0xff]   ;;  %v3606_v8 = vld [vmem:[%s5088_s1 + $0x568] ss:$16 sps:$4 sm:$0xff]  }
  0x7f   :  { %1371 = vmatpush2.bf16.msra.mxu0 %v3517_v10  ;;  %v3614_v10 = vld [vmem:[%s5088_s1 + $0x54c] ss:$16 sps:$4 sm:$0xff]  }
  0x80   :  { %1449 = vmatpush2.bf16.msra.mxu1 %v3514_v9  ;;  %1463 = vmatprep.subr.bf16.mxu0 %v3527_v12  ;;  %v3609_v9 = vld [vmem:[%s5088_s1 + $0x328] ss:$16 sps:$4 sm:$0xff]  }
  0x81   :  { %1450 = vmatprep.subr.bf16.mxu1 %v3524_v11  ;;  %v3617_v11 = vld [vmem:[%s5088_s1 + $0x30c] ss:$16 sps:$4 sm:$0xff]   ;;  %v3612_v12 = vld [vmem:[%s5088_s1 + $0x548] ss:$16 sps:$4 sm:$0xff]  }
  0x82   :  { %1373 = vmatmul.mubr.bf16.vlgmr.msra.gmra.mxu0 %v4336_v14 }
  0x83   :  { %1464 = vmatpush1.bf16.msra.mxu0 %v3525_v16  ;;  %1495 = vmatprep.mubr.bf16.mxu0 %v4068_v51  ;;  %v3543_v51 = vld [vmem:[%s5088_s1 + $0x288] ss:$16 sps:$4 sm:$0xff]   ;;  %v3620_v16 = vld [vmem:[%s5088_s1 + $0x52c] ss:$16 sps:$4 sm:$0xff]  }
  0x84   :  { %1451 = vmatpush2.bf16.msra.mxu1 %v3522_v15  ;;  %1465 = vmatprep.subr.bf16.mxu0 %v3533_v18  ;;  %v3615_v15 = vld [vmem:[%s5088_s1 + $0x308] ss:$16 sps:$4 sm:$0xff]  }
  0x85   :  { %1452 = vmatprep.subr.bf16.mxu1 %v3530_v17  ;;  %v3623_v17 = vld [vmem:[%s5088_s1 + $0x60c] ss:$16 sps:$4 sm:$0xff]   ;;  %v3618_v18 = vld [vmem:[%s5088_s1 + $0x528] ss:$16 sps:$4 sm:$0xff]  }
  0x87   :  { %1466 = vmatpush1.bf16.msra.mxu0 %v3531_v20  ;;  %v3626_v20 = vld [vmem:[%s5088_s1 + $0x50c] ss:$16 sps:$4 sm:$0xff]  }
  0x88   :  { %1453 = vmatpush2.bf16.msra.mxu1 %v3528_v19  ;;  %1467 = vmatprep.subr.bf16.mxu0 %v3539_v22  ;;  %v3621_v19 = vld [vmem:[%s5088_s1 + $0x608] ss:$16 sps:$4 sm:$0xff]  }
  0x89   :  { %1504 = vmatprep.subr.bf16.mxu1 %v3536_v21  ;;  %v3629_v21 = vld [vmem:[%s5090_s3 + $0xe4] ss:$16 sps:$4 sm:$0xff]   ;;  %v3624_v22 = vld [vmem:[%s5088_s1 + $0x508] ss:$16 sps:$4 sm:$0xff]  }
  0x8b   :  { %1455 = vmatmul.mubr.bf16.vlgmr.msra.gmra.mxu1 %v4126_v6  ;;  %1468 = vmatpush1.bf16.msra.mxu0 %v3537_v24  ;;  %v3549_v6 = vld [vmem:[%s5088_s1 + $0x268] ss:$16 sps:$4 sm:$0xff]   ;;  %v3632_v24 = vld [vmem:[%s5090_s3 + $0xc4] ss:$16 sps:$4 sm:$0xff]  }
  0x8c   :  { %1505 = vmatpush1.bf16.msra.mxu1 %v3534_v23  ;;  %1469 = vmatprep.subr.bf16.mxu0 %v3545_v26  ;;  %v3627_v23 = vld [vmem:[%s5090_s3 + $0xe0] ss:$16 sps:$4 sm:$0xff]  }
  0x8d   :  { %1506 = vmatprep.subr.bf16.mxu1 %v3542_v25  ;;  %1536 = vmatprep.mubr.bf16.mxu1 %v4211_v33  ;;  %v3555_v33 = vld [vmem:[%s5088_s1 + $0x248] ss:$16 sps:$4 sm:$0xff]   ;;  %v3630_v25 = vld [vmem:[%s5090_s3 + $0xc0] ss:$16 sps:$4 sm:$0xff]  }
  0x8e   :  { %v3633_v26 = vld [vmem:[%s5090_s3 + $0xa0] ss:$16 sps:$4 sm:$0xff]  }
  0x8f   :  { %1470 = vmatpush1.bf16.msra.mxu0 %v3543_v51 }
  0x90   :  { %1507 = vmatpush1.bf16.msra.mxu1 %v3540_v27  ;;  %1471 = vmatprep.subr.bf16.mxu0 %v3551_v29 }
  0x91   :  { %1508 = vmatprep.subr.bf16.mxu1 %v3548_v28 }
  0x93   :  { %1472 = vmatpush1.bf16.msra.mxu0 %v3549_v6 }
  0x94   :  { %1509 = vmatpush1.bf16.msra.mxu1 %v3546_v30  ;;  %1473 = vmatprep.subr.bf16.mxu0 %v3557_v32 }
  0x95   :  { %1510 = vmatprep.subr.bf16.mxu1 %v3554_v31 }
  0x97   :  { %1474 = vmatpush1.bf16.msra.mxu0 %v3555_v33 }
  0x98   :  { %1511 = vmatpush1.bf16.msra.mxu1 %v3552_v34  ;;  %1475 = vmatprep.subr.bf16.mxu0 %v3563_v36 }
  0x99   :  { %1512 = vmatprep.subr.bf16.mxu1 %v3560_v35 }
  0x9b   :  { %1476 = vmatpush1.bf16.msra.mxu0 %v3561_v38 }
  0x9c   :  { %1513 = vmatpush1.bf16.msra.mxu1 %v3558_v37  ;;  %1477 = vmatprep.subr.bf16.mxu0 %v3569_v40 }
  0x9d   :  { %1514 = vmatprep.subr.bf16.mxu1 %v3566_v39 }
  0x9f   :  { %1478 = vmatpush1.bf16.msra.mxu0 %v3567_v42 }
  0xa0   :  { %1515 = vmatpush1.bf16.msra.mxu1 %v3564_v41  ;;  %1479 = vmatprep.subr.bf16.mxu0 %v3575_v44 }
  0xa1   :  { %1516 = vmatprep.subr.bf16.mxu1 %v3572_v43 }
  0xa3   :  { %1480 = vmatpush2.bf16.msra.mxu0 %v3573_v46 }
  0xa4   :  { %1517 = vmatpush1.bf16.msra.mxu1 %v3570_v45  ;;  %1481 = vmatprep.subr.bf16.mxu0 %v3581_v48 }
  0xa5   :  { %1518 = vmatprep.subr.bf16.mxu1 %v3578_v47 }
  0xa7   :  { %1482 = vmatpush2.bf16.msra.mxu0 %v3579_v50 }
  0xa8   :  { %1519 = vmatpush1.bf16.msra.mxu1 %v3576_v49  ;;  %1483 = vmatprep.subr.bf16.mxu0 %v3587_v53 }
  0xa9   :  { %1520 = vmatprep.subr.bf16.mxu1 %v3584_v52 }
  0xab   :  { %1484 = vmatpush2.bf16.msra.mxu0 %v3585_v55 }
  0xac   :  { %1521 = vmatpush2.bf16.msra.mxu1 %v3582_v54  ;;  %1485 = vmatprep.subr.bf16.mxu0 %v3593_v57 }
  0xad   :  { %1522 = vmatprep.subr.bf16.mxu1 %v3590_v56 }
  0xaf   :  { %1486 = vmatpush2.bf16.msra.mxu0 %v3591_v59 }
  0xb0   :  { %1523 = vmatpush2.bf16.msra.mxu1 %v3588_v58  ;;  %1487 = vmatprep.subr.bf16.mxu0 %v3599_v61 }
  0xb1   :  { %1524 = vmatprep.subr.bf16.mxu1 %v3596_v60 }
  0xb3   :  { %1488 = vmatpush2.bf16.msra.mxu0 %v3597_v63 }
  0xb4   :  { %1525 = vmatpush2.bf16.msra.mxu1 %v3594_v62  ;;  %1489 = vmatprep.subr.bf16.mxu0 %v3605_v1 }
  0xb5   :  { %1526 = vmatprep.subr.bf16.mxu1 %v3602_v0 }
  0xb7   :  { %1490 = vmatpush2.bf16.msra.mxu0 %v3603_v3 }
  0xb8   :  { %1527 = vmatpush2.bf16.msra.mxu1 %v3600_v2  ;;  %1491 = vmatprep.subr.bf16.mxu0 %v3611_v5 }
  0xb9   :  { %1528 = vmatprep.subr.bf16.mxu1 %v3608_v4 }
  0xbb   :  { %1492 = vmatpush2.bf16.msra.mxu0 %v3609_v9 }
  0xbc   :  { %1529 = vmatpush2.bf16.msra.mxu1 %v3606_v8  ;;  %1493 = vmatprep.subr.bf16.mxu0 %v3617_v11 }
  0xbd   :  { %1530 = vmatprep.subr.bf16.mxu1 %v3614_v10 }
  0xbf   :  { %1494 = vmatpush2.bf16.msra.mxu0 %v3615_v15 }
  0xc0   :  { %1531 = vmatpush2.bf16.msra.mxu1 %v3612_v12  ;;  %1559 = vmatprep.subr.bf16.mxu0 %v3623_v17 }
  0xc1   :  { %1532 = vmatprep.subr.bf16.mxu1 %v3620_v16 }
  0xc2   :  { %1496 = vmatmul.mubr.bf16.vlgmr.msra.gmra.mxu0 %v4128_v7  ;;  %v3851_v7 = vld [vmem:[%s5087_s0 + $0x18] ss:$0 sps:$4 sm:$0xff]  }
  0xc3   :  { %1560 = vmatpush1.bf16.msra.mxu0 %v3621_v19  ;;  %1577 = vmatprep.mubr.bf16.mxu0 %v3874_v13  ;;  %v3635_v13 = vld [vmem:[%s5090_s3 + $0xa4] ss:$16 sps:$4 sm:$0xff]  }
  0xc4   :  { %1533 = vmatpush2.bf16.msra.mxu1 %v3618_v18  ;;  %2384 = vmatprep.subr.bf16.mxu0 %v3629_v21 }
  0xc5   :  { %1534 = vmatprep.subr.bf16.mxu1 %v3626_v20 }
  0xc8   :  { %1535 = vmatpush2.bf16.msra.mxu1 %v3624_v22 }
  0xca   :  { %3118 = vmatmul.mubr.msk.bf16.vlgmr.msra.gmra.mxu0 %vm1254_vm0, %v3851_v7 }
  0xcb   :  { %1537 = vmatmul.mubr.bf16.vlgmr.msra.gmra.mxu1 %v4336_v14  ;;  %2385 = vmatpush1.bf16.msra.mxu0 %v3627_v23 }
  0xcc   :  { %2386 = vmatprep.subr.bf16.mxu0 %v3632_v24 }
  0xcf   :  { %2387 = vmatpush1.bf16.msra.mxu0 %v3630_v25 }
  0xd0   :  { %12 = vsyncpa [#allocation3], 0  ;;  %2388 = vmatprep.subr.bf16.mxu0 %v3635_v13  ;;  %v3638_v14 = vld [vmem:[%s5090_s3 + $0x84] ss:$16 sps:$4 sm:$0xff]   ;;  %v3636_v27 = vld [vmem:[%s5090_s3 + $0x80] ss:$16 sps:$4 sm:$0xff]  }
  0xd1   :  { %v3681_v51 = vld [vmem:[%s5090_s3 + $0x2e0] ss:$16 sps:$4 sm:$0xff]   ;;  %v3683_v28 = vld [vmem:[%s5090_s3 + $0x2e4] ss:$16 sps:$4 sm:$0xff]   ;;  %v3677_v20 = vld [vmem:[%s5090_s3 + $0xec] ss:$16 sps:$4 sm:$0xff]  }
  0xd2   :  { %v3641_v29 = vld [vmem:[%s5090_s3 + $0x64] ss:$16 sps:$4 sm:$0xff]   ;;  %2425 = vmatprep.subr.bf16.mxu1 %v3683_v28  ;;  %v3639_v30 = vld [vmem:[%s5090_s3 + $0x60] ss:$16 sps:$4 sm:$0xff]   ;;  %s3875_s0 = smov [#allocation2]  }
  0xd3   :  { %2389 = vmatpush1.bf16.msra.mxu0 %v3633_v26  ;;  %2426 = vmatpush1.bf16.msra.mxu1 %v3681_v51  ;;  %v3687_v6 = vld [vmem:[%s5090_s3 + $0x2c0] ss:$16 sps:$4 sm:$0xff]   ;;  %v3689_v31 = vld [vmem:[%s5090_s3 + $0x2c4] ss:$16 sps:$4 sm:$0xff]   ;;  %s2906_s25 = sshll.u32 %s3875_s0, 4  ;;  %s2907_s25 = int_to_ptr.vmem [resolvable:$true] %s2906_s25 }
  0xd4   :  { %2390 = vmatprep.subr.bf16.mxu0 %v3638_v14  ;;  %v3644_v32 = vld [vmem:[%s5090_s3 + $0x44] ss:$16 sps:$4 sm:$0xff]   ;;  %2427 = vmatprep.subr.bf16.mxu1 %v3689_v31  ;;  %v3642_v34 = vld [vmem:[%s5090_s3 + $0x40] ss:$16 sps:$4 sm:$0xff]   ;;  %v3773_v31 = vld [vmem:[%s5090_s3 + $0x2ec] ss:$16 sps:$4 sm:$0xff]   ;;  %p3857_p1 = scmp.lt.s32.totalorder %s2907_s25, %s2907_s25 }
  0xd5   :  { %v3693_v33 = vld [vmem:[%s5090_s3 + $0x2a0] ss:$16 sps:$4 sm:$0xff]   ;;  %v3695_v35 = vld [vmem:[%s5090_s3 + $0x2a4] ss:$16 sps:$4 sm:$0xff]   ;;  %s3852_s26 = scalar_lea.vmem %s2907_s25, 128 }
  0xd6   :  { %v3647_v36 = vld [vmem:[%s5090_s3 + $0x24] ss:$16 sps:$4 sm:$0xff]   ;;  %v3645_v37 = vld [vmem:[%s5090_s3 + $0x20] ss:$16 sps:$4 sm:$0xff]   ;;  %p3853_p0 = scmp.ne.s32.totalorder %s2907_s25, %s3852_s26  ;;  %p3858_p2 = scmp.lt.s32.totalorder %s3852_s26, %s3852_s26 }
  0xd7   :  { %2391 = vmatpush1.bf16.msra.mxu0 %v3636_v27  ;;  %2428 = vmatpush1.bf16.msra.mxu1 %v3687_v6  ;;  %v3699_v38 = vld [vmem:[%s5090_s3 + $0x280] ss:$16 sps:$4 sm:$0xff]   ;;  %v3701_v39 = vld [vmem:[%s5090_s3 + $0x284] ss:$16 sps:$4 sm:$0xff]  }
  0xd8   :  { %2392 = vmatprep.subr.bf16.mxu0 %v3641_v29  ;;  %2429 = vmatprep.subr.bf16.mxu1 %v3695_v35  ;;  %v3650_v40 = vld [vmem:[%s5090_s3 + $0x4] ss:$16 sps:$4 sm:$0xff]   ;;  %v3648_v41 = vld [vmem:[%s5090_s3] ss:$16 sps:$4 sm:$0xff]   ;;  %p3859_p3 = por %p3858_p2, %p3857_p1 }
  0xd9   :  { %v3705_v42 = vld [vmem:[%s5090_s3 + $0x260] ss:$16 sps:$4 sm:$0xff]   ;;  %v3707_v43 = vld [vmem:[%s5090_s3 + $0x264] ss:$16 sps:$4 sm:$0xff]  }
  0xda   :  { %v3653_v44 = vld [vmem:[%s5090_s3 + $0x1e4] ss:$16 sps:$4 sm:$0xff]   ;;  %v3651_v45 = vld [vmem:[%s5090_s3 + $0x1e0] ss:$16 sps:$4 sm:$0xff]   ;;  %p3860_p4 = pnand %p3859_p3, %p3853_p0 }
  0xdb   :  { %2393 = vmatpush1.bf16.msra.mxu0 %v3639_v30  ;;  %2430 = vmatpush1.bf16.msra.mxu1 %v3693_v33  ;;  %v3711_v46 = vld [vmem:[%s5090_s3 + $0x240] ss:$16 sps:$4 sm:$0xff]   ;;  %v3713_v47 = vld [vmem:[%s5090_s3 + $0x244] ss:$16 sps:$4 sm:$0xff]  }
  0xdc   :  { %2394 = vmatprep.subr.bf16.mxu0 %v3644_v32  ;;  %2431 = vmatprep.subr.bf16.mxu1 %v3701_v39  ;;  %v3656_v48 = vld [vmem:[%s5090_s3 + $0x1c4] ss:$16 sps:$4 sm:$0xff]   ;;  %v3654_v49 = vld [vmem:[%s5090_s3 + $0x1c0] ss:$16 sps:$4 sm:$0xff]   ;;  %v230_v32 = vlaneseq }
  0xdd   :  { %v3717_v50 = vld [vmem:[%s5090_s3 + $0x220] ss:$16 sps:$4 sm:$0xff]   ;;  %v3719_v52 = vld [vmem:[%s5090_s3 + $0x224] ss:$16 sps:$4 sm:$0xff]  }
  0xde   :  { %v3659_v53 = vld [vmem:[%s5090_s3 + $0x1a4] ss:$16 sps:$4 sm:$0xff]   ;;  %v3657_v54 = vld [vmem:[%s5090_s3 + $0x1a0] ss:$16 sps:$4 sm:$0xff]  }
  0xdf   :  { %2395 = vmatpush1.bf16.msra.mxu0 %v3642_v34  ;;  %2432 = vmatpush1.bf16.msra.mxu1 %v3699_v38  ;;  %v3723_v55 = vld [vmem:[%s5090_s3 + $0x200] ss:$16 sps:$4 sm:$0xff]   ;;  %v3725_v56 = vld [vmem:[%s5090_s3 + $0x204] ss:$16 sps:$4 sm:$0xff]   ;;  %v4751_v34 = vshrl.u32 %v230_v32, 7 }
  0xe0   :  { %2396 = vmatprep.subr.bf16.mxu0 %v3647_v36  ;;  %2433 = vmatprep.subr.bf16.mxu1 %v3707_v43  ;;  %v3662_v57 = vld [vmem:[%s5090_s3 + $0x184] ss:$16 sps:$4 sm:$0xff]   ;;  %v3660_v58 = vld [vmem:[%s5090_s3 + $0x180] ss:$16 sps:$4 sm:$0xff]  }
  0xe1   :  { %v3729_v59 = vld [vmem:[%s5090_s3 + $0x3e0] ss:$16 sps:$4 sm:$0xff]   ;;  %v3731_v60 = vld [vmem:[%s5090_s3 + $0x3e4] ss:$16 sps:$4 sm:$0xff]   ;;  %v232_v33 = vsub.s32 0, %v4751_v34  ;;  %v236_v36 = vsub.s32 1, %v4751_v34 }
  0xe2   :  { %v3665_v61 = vld [vmem:[%s5090_s3 + $0x164] ss:$16 sps:$4 sm:$0xff]   ;;  %v3663_v62 = vld [vmem:[%s5090_s3 + $0x160] ss:$16 sps:$4 sm:$0xff]  }
  0xe3   :  { %2397 = vmatpush1.bf16.msra.mxu0 %v3645_v37  ;;  %2434 = vmatpush1.bf16.msra.mxu1 %v3705_v42  ;;  %v3735_v63 = vld [vmem:[%s5090_s3 + $0x3c0] ss:$16 sps:$4 sm:$0xff]   ;;  %v3737_v0 = vld [vmem:[%s5090_s3 + $0x3c4] ss:$16 sps:$4 sm:$0xff]  }
  0xe4   :  { %2398 = vmatprep.subr.bf16.mxu0 %v3650_v40  ;;  %2435 = vmatprep.subr.bf16.mxu1 %v3713_v47  ;;  %v3668_v1 = vld [vmem:[%s5090_s3 + $0x144] ss:$16 sps:$4 sm:$0xff]   ;;  %v3666_v2 = vld [vmem:[%s5090_s3 + $0x140] ss:$16 sps:$4 sm:$0xff]  }
  0xe5   :  { %v3741_v3 = vld [vmem:[%s5090_s3 + $0x3a0] ss:$16 sps:$4 sm:$0xff]   ;;  %v3743_v4 = vld [vmem:[%s5090_s3 + $0x3a4] ss:$16 sps:$4 sm:$0xff]  }
  0xe6   :  { %v3671_v5 = vld [vmem:[%s5090_s3 + $0x124] ss:$16 sps:$4 sm:$0xff]   ;;  %v3669_v8 = vld [vmem:[%s5090_s3 + $0x120] ss:$16 sps:$4 sm:$0xff]  }
  0xe7   :  { %2399 = vmatpush1.bf16.msra.mxu0 %v3648_v41  ;;  %2436 = vmatpush1.bf16.msra.mxu1 %v3711_v46  ;;  %v3747_v9 = vld [vmem:[%s5090_s3 + $0x380] ss:$16 sps:$4 sm:$0xff]   ;;  %v3749_v10 = vld [vmem:[%s5090_s3 + $0x384] ss:$16 sps:$4 sm:$0xff]  }
  0xe8   :  { %2400 = vmatprep.subr.bf16.mxu0 %v3653_v44  ;;  %2437 = vmatprep.subr.bf16.mxu1 %v3719_v52  ;;  %v3674_v11 = vld [vmem:[%s5090_s3 + $0x104] ss:$16 sps:$4 sm:$0xff]   ;;  %v3672_v16 = vld [vmem:[%s5090_s3 + $0x100] ss:$16 sps:$4 sm:$0xff]  }
  0xe9   :  { %v3755_v17 = vld [vmem:[%s5090_s3 + $0x364] ss:$16 sps:$4 sm:$0xff]   ;;  %v3753_v21 = vld [vmem:[%s5090_s3 + $0x360] ss:$16 sps:$4 sm:$0xff]  }
  0xea   :  { %v3761_v24 = vld [vmem:[%s5090_s3 + $0x344] ss:$16 sps:$4 sm:$0xff]   ;;  %v3759_v13 = vld [vmem:[%s5090_s3 + $0x340] ss:$16 sps:$4 sm:$0xff]  }
  0xeb   :  { %2401 = vmatpush2.bf16.msra.mxu0 %v3651_v45  ;;  %2438 = vmatpush1.bf16.msra.mxu1 %v3717_v50  ;;  %v3767_v14 = vld [vmem:[%s5090_s3 + $0x324] ss:$16 sps:$4 sm:$0xff]   ;;  %v3765_v51 = vld [vmem:[%s5090_s3 + $0x320] ss:$16 sps:$4 sm:$0xff]  }
  0xec   :  { %2402 = vmatprep.subr.bf16.mxu0 %v3656_v48  ;;  %2439 = vmatprep.subr.bf16.mxu1 %v3725_v56  ;;  %v3770_v29 = vld [vmem:[%s5090_s3 + $0x304] ss:$16 sps:$4 sm:$0xff]   ;;  %v3768_v6 = vld [vmem:[%s5090_s3 + $0x300] ss:$16 sps:$4 sm:$0xff]   ;;  %v3675_v56 = vld [vmem:[%s5090_s3 + $0xe8] ss:$16 sps:$4 sm:$0xff]  }
  0xed   :  { %v4757_v35 = vld [vmem:[%s5089_s2] sm:$0xf] }
  0xee   :  { %v233_v37 = vrot.slane %v4757_v35, %v232_v33  ;;  %v237_v38 = vrot.slane %v4757_v35, %v236_v36 }
  0xef   :  { %2403 = vmatpush2.bf16.msra.mxu0 %v3654_v49  ;;  %2440 = vmatpush1.bf16.msra.mxu1 %v3723_v55 }
  0xf0   :  { %2404 = vmatprep.subr.bf16.mxu0 %v3659_v53  ;;  %2441 = vmatprep.subr.bf16.mxu1 %v3731_v60 }
  0xf3   :  { %2405 = vmatpush2.bf16.msra.mxu0 %v3657_v54  ;;  %2442 = vmatpush2.bf16.msra.mxu1 %v3729_v59  ;;  %v3680_v59 = vld [vmem:[%s5090_s3 + $0xcc] ss:$16 sps:$4 sm:$0xff]  }
  0xf4   :  { %2406 = vmatprep.subr.bf16.mxu0 %v3662_v57  ;;  %2443 = vmatprep.subr.bf16.mxu1 %v3737_v0  ;;  %v3684_v0 = vld [vmem:[%s5090_s3 + $0xa8] ss:$16 sps:$4 sm:$0xff]  }
  0xf7   :  { %2407 = vmatpush2.bf16.msra.mxu0 %v3660_v58  ;;  %2444 = vmatpush2.bf16.msra.mxu1 %v3735_v63  ;;  %v3686_v63 = vld [vmem:[%s5090_s3 + $0xac] ss:$16 sps:$4 sm:$0xff]  }
  0xf8   :  { %2408 = vmatprep.subr.bf16.mxu0 %v3665_v61  ;;  %2445 = vmatprep.subr.bf16.mxu1 %v3743_v4  ;;  %v3678_v61 = vld [vmem:[%s5090_s3 + $0xc8] ss:$16 sps:$4 sm:$0xff]  }
  0xf9   :  { %v3696_v4 = vld [vmem:[%s5090_s3 + $0x68] ss:$16 sps:$4 sm:$0xff]  }
  0xfb   :  { %2409 = vmatpush2.bf16.msra.mxu0 %v3663_v62  ;;  %2446 = vmatpush2.bf16.msra.mxu1 %v3741_v3  ;;  %v3698_v3 = vld [vmem:[%s5090_s3 + $0x6c] ss:$16 sps:$4 sm:$0xff]  }
  0xfc   :  { %2410 = vmatprep.subr.bf16.mxu0 %v3668_v1  ;;  %2447 = vmatprep.subr.bf16.mxu1 %v3749_v10  ;;  %v3692_v1 = vld [vmem:[%s5090_s3 + $0x8c] ss:$16 sps:$4 sm:$0xff]   ;;  %v3708_v10 = vld [vmem:[%s5090_s3 + $0x28] ss:$16 sps:$4 sm:$0xff]  }
  0xff   :  { %2411 = vmatpush2.bf16.msra.mxu0 %v3666_v2  ;;  %2448 = vmatpush2.bf16.msra.mxu1 %v3747_v9  ;;  %v3690_v2 = vld [vmem:[%s5090_s3 + $0x88] ss:$16 sps:$4 sm:$0xff]   ;;  %v3710_v9 = vld [vmem:[%s5090_s3 + $0x2c] ss:$16 sps:$4 sm:$0xff]  }
 0x100   :  { %2412 = vmatprep.subr.bf16.mxu0 %v3671_v5  ;;  %2449 = vmatprep.subr.bf16.mxu1 %v3755_v17  ;;  %v3704_v5 = vld [vmem:[%s5090_s3 + $0x4c] ss:$16 sps:$4 sm:$0xff]  }
 0x101   :  { %v3728_v17 = vld [vmem:[%s5090_s3 + $0x1cc] ss:$16 sps:$4 sm:$0xff]  }
 0x102   :  { %v1292_v12 = vpop.f32.mrf.mxu0 }
 0x103   :  { %v1333_v15 = vpop.f32.mrf.mxu1  ;;  %2413 = vmatpush2.bf16.msra.mxu0 %v3669_v8  ;;  %2450 = vmatpush2.bf16.msra.mxu1 %v3753_v21  ;;  %v1293_v39 = vadd.f32 %v1292_v12, %v233_v37  ;;  %v3702_v8 = vld [vmem:[%s5090_s3 + $0x48] ss:$16 sps:$4 sm:$0xff]   ;;  %v3740_v21 = vld [vmem:[%s5090_s3 + $0x18c] ss:$16 sps:$4 sm:$0xff]  }
 0x104   :  { %v1294_v18 = vpop.f32.mrf.mxu0  ;;  %2414 = vmatprep.subr.bf16.mxu0 %v3674_v11  ;;  %2451 = vmatprep.subr.bf16.mxu1 %v3761_v24  ;;  %v3716_v11 = vld [vmem:[%s5090_s3 + $0xc] ss:$16 sps:$4 sm:$0xff]   ;;  %v3714_v12 = vld [vmem:[%s5090_s3 + $0x8] ss:$16 sps:$4 sm:$0xff]  }
 0x105   :  { %v1335_v19 = vpop.f32.mrf.mxu1  ;;  %v1295_v40 = vadd.f32 %v1294_v18, %v237_v38  ;;  %v1334_v41 = vadd.f32 %v1333_v15, %v1293_v39  ;;  %v3722_v15 = vld [vmem:[%s5090_s3 + $0x1ec] ss:$16 sps:$4 sm:$0xff]   ;;  %v3726_v18 = vld [vmem:[%s5090_s3 + $0x1c8] ss:$16 sps:$4 sm:$0xff]  }
 0x106   :  { %v1296_v22 = vpop.f32.mrf.mxu0  ;;  %v3744_v24 = vld [vmem:[%s5090_s3 + $0x168] ss:$16 sps:$4 sm:$0xff]  }
 0x107   :  { %v1337_v23 = vpop.f32.mrf.mxu1  ;;  %2415 = vmatpush2.bf16.msra.mxu0 %v3672_v16  ;;  %2452 = vmatpush2.bf16.msra.mxu1 %v3759_v13  ;;  %v1336_v43 = vadd.f32 %v1335_v19, %v1295_v40  ;;  %v3720_v16 = vld [vmem:[%s5090_s3 + $0x1e8] ss:$16 sps:$4 sm:$0xff]   ;;  %v3734_v19 = vld [vmem:[%s5090_s3 + $0x1ac] ss:$16 sps:$4 sm:$0xff]  }
 0x108   :  { %v1297_v25 = vpop.f32.mrf.mxu0  ;;  %2466 = vmatprep.subr.bf16.mxu0 %v3677_v20  ;;  %2453 = vmatprep.subr.bf16.mxu1 %v3767_v14  ;;  %v3732_v20 = vld [vmem:[%s5090_s3 + $0x1a8] ss:$16 sps:$4 sm:$0xff]   ;;  %v3746_v23 = vld [vmem:[%s5090_s3 + $0x16c] ss:$16 sps:$4 sm:$0xff]   ;;  %v244_v14 = vsub.s32 3, %v4751_v34 }
 0x109   :  { %v1338_v7 = vpop.f32.mrf.mxu1  ;;  %v3738_v22 = vld [vmem:[%s5090_s3 + $0x188] ss:$16 sps:$4 sm:$0xff]   ;;  %v3752_v25 = vld [vmem:[%s5090_s3 + $0x14c] ss:$16 sps:$4 sm:$0xff]  }
 0x10a   :  { %v240_v7 = vsub.s32 2, %v4751_v34  ;;  %v3750_v13 = vld [vmem:[%s5090_s3 + $0x148] ss:$16 sps:$4 sm:$0xff]  }
 0x10b   :  { %v1415_v26 = vpop.f32.mrf.mxu1  ;;  %2454 = vmatpush2.bf16.msra.mxu1 %v3765_v51  ;;  %v3762_v37 = vld [vmem:[%s5090_s3 + $0x108] ss:$16 sps:$4 sm:$0xff]  }
 0x10c   :  { %2455 = vmatprep.subr.bf16.mxu1 %v3770_v29  ;;  %v241_v51 = vrot.slane %v4757_v35, %v240_v7 }
 0x10d   :  { %v1417_v27 = vpop.f32.mrf.mxu1 }
 0x10f   :  { %v1419_v28 = vpop.f32.mrf.mxu1  ;;  %2456 = vmatpush2.bf16.msra.mxu1 %v3768_v6  ;;  %v245_v6 = vrot.slane %v4757_v35, %v244_v14 }
 0x110   :  { %2507 = vmatprep.subr.bf16.mxu1 %v3773_v31  ;;  %v3756_v28 = vld [vmem:[%s5090_s3 + $0x128] ss:$16 sps:$4 sm:$0xff]  }
 0x111   :  { %v1420_v30 = vpop.f32.mrf.mxu1 }
 0x112   :  { %v3764_v30 = vld [vmem:[%s5090_s3 + $0x10c] ss:$16 sps:$4 sm:$0xff]  }
 0x142   :  { %v1374_v42 = vpop.f32.mrf.mxu0 }
 0x143   :  { %v1375_v44 = vadd.f32 %v1374_v42, %v1334_v41 }
 0x144   :  { %v1376_v45 = vpop.f32.mrf.mxu0 }
 0x145   :  { %v1416_v46 = vadd.f32 %v1415_v26, %v1375_v44  ;;  %v1377_v47 = vadd.f32 %v1376_v45, %v1336_v43  ;;  %v3758_v26 = vld [vmem:[%s5090_s3 + $0x12c] ss:$16 sps:$4 sm:$0xff]  }
 0x146   :  { %v1378_v48 = vpop.f32.mrf.mxu0 }
 0x147   :  { %v1418_v49 = vadd.f32 %v1417_v27, %v1377_v47  ;;  %v1586_v50 = vmax.f32 %v1416_v46, 0.0 }
 0x148   :  { %v1379_v52 = vpop.f32.mrf.mxu0 }
 0x149   :  { %v1587_v53 = vmax.f32 %v1418_v49, 0.0  ;;  %v4771_v57 = vpack.c.bf16 %v1586_v50, %v1586_v50 }
 0x14b   :  { %v4766_v54 = vpop.f32.mrf.mxu1  ;;  %v1591_v55 = vpack.c.bf16 %v1587_v53, %v1587_v53 }
 0x14c   :  { %v1457_v32 = vadd.f32 %v4766_v54, %v241_v51  ;;  %v3809_v51 = vld [vmem:[%s5090_s3 + $0x36c] ss:$16 sps:$4 sm:$0xff]  }
 0x14d   :  { %v4773_v58 = vpop.f32.mrf.mxu1  ;;  %2416 = vmatprep.mubr.bf16.mxu0 %v1591_v55 }
 0x14e   :  { %2417 = vmatmul.mubr.bf16.vlgmr.msra.gmra.mxu0 %v4771_v57  ;;  %v1459_v39 = vadd.f32 %v4773_v58, %v245_v6  ;;  %v3771_v58 = vld [vmem:[%s5090_s3 + $0x2e8] ss:$16 sps:$4 sm:$0xff]   ;;  %v3815_v6 = vld [vmem:[%s5090_s3 + $0x32c] ss:$16 sps:$4 sm:$0xff]  }
 0x14f   :  { %v1460_v60 = vpop.f32.mrf.mxu1  ;;  %2467 = vmatpush1.bf16.msra.mxu0 %v3675_v56  ;;  %2498 = vmatprep.mubr.bf16.mxu0 %v1591_v55 }
 0x150   :  { %2468 = vmatprep.subr.bf16.mxu0 %v3680_v59  ;;  %v3776_v60 = vld [vmem:[%s5090_s3 + $0x2cc] ss:$16 sps:$4 sm:$0xff]  }
 0x151   :  { %v1461_v62 = vpop.f32.mrf.mxu1 }
 0x152   :  { %v3821_v62 = vld [vmem:[%s5092_s5 + $0x70] sm:$0xff]  }
 0x153   :  { %2469 = vmatpush1.bf16.msra.mxu0 %v3678_v61  ;;  %v3820_v61 = vld [vmem:[%s5092_s5 + $0x38] sm:$0xff]  }
 0x154   :  { %2470 = vmatprep.subr.bf16.mxu0 %v3686_v63  ;;  %v3774_v63 = vld [vmem:[%s5090_s3 + $0x2c8] ss:$16 sps:$4 sm:$0xff]  }
 0x157   :  { %2471 = vmatpush1.bf16.msra.mxu0 %v3684_v0  ;;  %v3779_v0 = vld [vmem:[%s5090_s3 + $0x2ac] ss:$16 sps:$4 sm:$0xff]  }
 0x158   :  { %2472 = vmatprep.subr.bf16.mxu0 %v3692_v1  ;;  %v3822_v1 = vld [vmem:[%s5092_s5 + $0x30] sm:$0xff]  }
 0x15b   :  { %2473 = vmatpush1.bf16.msra.mxu0 %v3690_v2  ;;  %v3823_v2 = vld [vmem:[%s5092_s5 + $0x68] sm:$0xff]  }
 0x15c   :  { %2474 = vmatprep.subr.bf16.mxu0 %v3698_v3  ;;  %v3777_v3 = vld [vmem:[%s5090_s3 + $0x2a8] ss:$16 sps:$4 sm:$0xff]  }
 0x15f   :  { %2475 = vmatpush1.bf16.msra.mxu0 %v3696_v4  ;;  %v3782_v4 = vld [vmem:[%s5090_s3 + $0x28c] ss:$16 sps:$4 sm:$0xff]  }
 0x160   :  { %2476 = vmatprep.subr.bf16.mxu0 %v3704_v5  ;;  %v3824_v5 = vld [vmem:[%s5092_s5 + $0x28] sm:$0xff]  }
 0x163   :  { %2477 = vmatpush1.bf16.msra.mxu0 %v3702_v8  ;;  %v3825_v8 = vld [vmem:[%s5092_s5 + $0x60] sm:$0xff]  }
 0x164   :  { %2478 = vmatprep.subr.bf16.mxu0 %v3710_v9  ;;  %v3780_v9 = vld [vmem:[%s5090_s3 + $0x288] ss:$16 sps:$4 sm:$0xff]  }
 0x167   :  { %2479 = vmatpush1.bf16.msra.mxu0 %v3708_v10  ;;  %v3785_v10 = vld [vmem:[%s5090_s3 + $0x26c] ss:$16 sps:$4 sm:$0xff]  }
 0x168   :  { %2480 = vmatprep.subr.bf16.mxu0 %v3716_v11  ;;  %v3826_v11 = vld [vmem:[%s5092_s5 + $0x20] sm:$0xff]  }
 0x16b   :  { %2481 = vmatpush1.bf16.msra.mxu0 %v3714_v12  ;;  %v3783_v12 = vld [vmem:[%s5090_s3 + $0x268] ss:$16 sps:$4 sm:$0xff]  }
 0x16c   :  { %2482 = vmatprep.subr.bf16.mxu0 %v3722_v15  ;;  %v3788_v15 = vld [vmem:[%s5090_s3 + $0x24c] ss:$16 sps:$4 sm:$0xff]  }
 0x16f   :  { %2483 = vmatpush2.bf16.msra.mxu0 %v3720_v16  ;;  %v3786_v16 = vld [vmem:[%s5090_s3 + $0x248] ss:$16 sps:$4 sm:$0xff]  }
 0x170   :  { %2484 = vmatprep.subr.bf16.mxu0 %v3728_v17  ;;  %v3791_v17 = vld [vmem:[%s5090_s3 + $0x22c] ss:$16 sps:$4 sm:$0xff]  }
 0x173   :  { %2485 = vmatpush2.bf16.msra.mxu0 %v3726_v18  ;;  %v3789_v18 = vld [vmem:[%s5090_s3 + $0x228] ss:$16 sps:$4 sm:$0xff]  }
 0x174   :  { %2486 = vmatprep.subr.bf16.mxu0 %v3734_v19  ;;  %v3794_v19 = vld [vmem:[%s5090_s3 + $0x20c] ss:$16 sps:$4 sm:$0xff]  }
 0x177   :  { %2487 = vmatpush2.bf16.msra.mxu0 %v3732_v20  ;;  %v3792_v20 = vld [vmem:[%s5090_s3 + $0x208] ss:$16 sps:$4 sm:$0xff]  }
 0x178   :  { %2488 = vmatprep.subr.bf16.mxu0 %v3740_v21  ;;  %v3797_v21 = vld [vmem:[%s5090_s3 + $0x3ec] ss:$16 sps:$4 sm:$0xff]  }
 0x17b   :  { %2489 = vmatpush2.bf16.msra.mxu0 %v3738_v22  ;;  %v3795_v22 = vld [vmem:[%s5090_s3 + $0x3e8] ss:$16 sps:$4 sm:$0xff]  }
 0x17c   :  { %2490 = vmatprep.subr.bf16.mxu0 %v3746_v23  ;;  %v3800_v23 = vld [vmem:[%s5090_s3 + $0x3cc] ss:$16 sps:$4 sm:$0xff]  }
 0x17f   :  { %2491 = vmatpush2.bf16.msra.mxu0 %v3744_v24  ;;  %v3798_v24 = vld [vmem:[%s5090_s3 + $0x3c8] ss:$16 sps:$4 sm:$0xff]  }
 0x180   :  { %2492 = vmatprep.subr.bf16.mxu0 %v3752_v25  ;;  %v3803_v25 = vld [vmem:[%s5090_s3 + $0x3ac] ss:$16 sps:$4 sm:$0xff]  }
 0x182   :  { %v1497_v27 = vpop.f32.mrf.mxu0 }
 0x183   :  { %2493 = vmatpush2.bf16.msra.mxu0 %v3750_v13  ;;  %v1498_v40 = vadd.f32 %v1497_v27, %v1457_v32  ;;  %v3801_v13 = vld [vmem:[%s5090_s3 + $0x3a8] ss:$16 sps:$4 sm:$0xff]   ;;  %v3818_v32 = vld [vmem:[%s5090_s3 + $0x30c] ss:$16 sps:$4 sm:$0xff]  }
 0x184   :  { %v1499_v29 = vpop.f32.mrf.mxu0  ;;  %2494 = vmatprep.subr.bf16.mxu0 %v3758_v26  ;;  %v3806_v26 = vld [vmem:[%s5090_s3 + $0x38c] ss:$16 sps:$4 sm:$0xff]   ;;  %v3804_v27 = vld [vmem:[%s5090_s3 + $0x388] ss:$16 sps:$4 sm:$0xff]  }
 0x185   :  { %v1500_v43 = vadd.f32 %v1499_v29, %v1459_v39  ;;  %v3812_v29 = vld [vmem:[%s5090_s3 + $0x34c] ss:$16 sps:$4 sm:$0xff]  }
 0x186   :  { %v1501_v31 = vpop.f32.mrf.mxu0  ;;  %v3828_v39 = vld [vmem:[%s5092_s5 + $0x18] sm:$0xff]  }
 0x187   :  { %2495 = vmatpush2.bf16.msra.mxu0 %v3756_v28  ;;  %v3807_v28 = vld [vmem:[%s5090_s3 + $0x368] ss:$16 sps:$4 sm:$0xff]  }
 0x188   :  { %v1502_v38 = vpop.f32.mrf.mxu0  ;;  %2496 = vmatprep.subr.bf16.mxu0 %v3764_v30  ;;  %v3810_v30 = vld [vmem:[%s5090_s3 + $0x348] ss:$16 sps:$4 sm:$0xff]  }
 0x189   :  { %v3813_v31 = vld [vmem:[%s5090_s3 + $0x328] ss:$16 sps:$4 sm:$0xff]  }
 0x18a   :  { %v1579_v42 = vpop.f32.mrf.mxu0  ;;  %v3827_v38 = vld [vmem:[%s5092_s5 + $0x58] sm:$0xff]  }
 0x18b   :  { %v1538_v41 = vpop.f32.mrf.mxu1  ;;  %2497 = vmatpush2.bf16.msra.mxu0 %v3762_v37  ;;  %v3816_v37 = vld [vmem:[%s5090_s3 + $0x308] ss:$16 sps:$4 sm:$0xff]  }
 0x18c   :  { %v1539_v44 = vadd.f32 %v1538_v41, %v1498_v40  ;;  %v1581_v35 = vpop.f32.mrf.mxu0  ;;  %v3829_v40 = vld [vmem:[%s5092_s5 + $0x50] sm:$0xff]  }
 0x18d   :  { %v1540_v45 = vpop.f32.mrf.mxu1  ;;  %v3830_v41 = vld [vmem:[%s5092_s5 + $0x10] sm:$0xff]  }
 0x18e   :  { %v1580_v46 = vadd.f32 %v1579_v42, %v1539_v44  ;;  %v1541_v47 = vadd.f32 %v1540_v45, %v1500_v43  ;;  %2499 = vmatmul.mubr.bf16.vlgmr.msra.gmra.mxu0 %v4771_v57  ;;  %v1583_v49 = vpop.f32.mrf.mxu0  ;;  %v3819_v57 = vld [vmem:[%s5092_s5 + $0x78] sm:$0xff]   ;;  %v3831_v42 = vld [vmem:[%s5092_s5 + $0x48] sm:$0xff]   ;;  %v3833_v44 = vld [vmem:[%s5092_s5 + $0x40] sm:$0xff]  }
 0x18f   :  { %v1542_v48 = vpop.f32.mrf.mxu1  ;;  %3280 = vmatprep.subr.bf16.mxu0 %v3819_v57  ;;  %v3832_v43 = vld [vmem:[%s5092_s5 + $0x8] sm:$0xff]   ;;  %v3834_v45 = vld [vmem:[%s5092_s5] sm:$0xff]  }
 0x190   :  { %v1582_v50 = vadd.f32 %v1581_v35, %v1541_v47  ;;  %v1588_v52 = vmax.f32 %v1580_v46, 0.0  ;;  %v1584_v54 = vpop.f32.mrf.mxu0  ;;  %3281 = vmatpush3.bf16.msra.mxu0 %v3820_v61  ;;  %v3835_v35 = vld [vmem:[%s5092_s5 + $0xf8] sm:$0xff]   ;;  %v3837_v47 = vld [vmem:[%s5092_s5 + $0xf0] sm:$0xff]   ;;  %v3839_v49 = vld [vmem:[%s5092_s5 + $0xe8] sm:$0xff]  }
 0x191   :  { %v1543_v53 = vpop.f32.mrf.mxu1  ;;  %3282 = vmatprep.subr.bf16.mxu0 %v3821_v62  ;;  %v3836_v46 = vld [vmem:[%s5092_s5 + $0xb8] sm:$0xff]   ;;  %v3838_v48 = vld [vmem:[%s5092_s5 + $0xb0] sm:$0xff]   ;;  %v3847_v62 = vld [vmem:[%s5092_s5 + $0xc8] sm:$0xff]  }
 0x192   :  { %v1589_v55 = vmax.f32 %v1582_v50, 0.0  ;;  %v4880_v59 = vpack.c.bf16 %v1588_v52, %v1588_v52  ;;  %v3840_v50 = vld [vmem:[%s5092_s5 + $0xa8] sm:$0xff]   ;;  %v3841_v52 = vld [vmem:[%s5092_s5 + $0xe0] sm:$0xff]   ;;  %v3843_v54 = vld [vmem:[%s5092_s5 + $0xd8] sm:$0xff]  }
 0x193   :  { %v3842_v53 = vld [vmem:[%s5092_s5 + $0xa0] sm:$0xff]  }
 0x194   :  { %v1593_v56 = vpack.c.bf16 %v1589_v55, %v1589_v55  ;;  %3283 = vmatpush3.bf16.msra.mxu0 %v3822_v1  ;;  %v3844_v55 = vld [vmem:[%s5092_s5 + $0x98] sm:$0xff]   ;;  %v3850_v1 = vld [vmem:[%s5092_s5 + $0x80] sm:$0xff]  }
 0x195   :  { %3284 = vmatprep.subr.bf16.mxu0 %v3823_v2  ;;  %v1722_v2 = vld [vmem:[%s5091_s4] sm:$0xf] }
 0x196   :  { %2457 = vmatprep.mubr.bf16.mxu1 %v1593_v56 }
 0x197   :  { %2458 = vmatmul.mubr.bf16.vlgmr.msra.gmra.mxu1 %v4880_v59 }
 0x198   :  { %2508 = vmatpush1.bf16.msra.mxu1 %v3771_v58  ;;  %2539 = vmatprep.mubr.bf16.mxu1 %v1593_v56  ;;  %v3845_v56 = vld [vmem:[%s5092_s5 + $0xd0] sm:$0xff]  }
 0x199   :  { %2509 = vmatprep.subr.bf16.mxu1 %v3776_v60  ;;  %3285 = vmatpush3.bf16.msra.mxu0 %v3824_v5  ;;  %v3846_v58 = vld [vmem:[%s5092_s5 + $0x90] sm:$0xff]   ;;  %v1727_v5 = vrot.slane %v1722_v2, %v232_v33  ;;  %v1735_v33 = vrot.slane %v1722_v2, %v240_v7 }
 0x19a   :  { %3286 = vmatprep.subr.bf16.mxu0 %v3825_v8 }
 0x19c   :  { %2510 = vmatpush1.bf16.msra.mxu1 %v3774_v63  ;;  %v3848_v63 = vld [vmem:[%s5092_s5 + $0x88] sm:$0xff]  }
 0x19d   :  { %2511 = vmatprep.subr.bf16.mxu1 %v3779_v0  ;;  %3287 = vmatpush3.bf16.msra.mxu0 %v3826_v11  ;;  %v3849_v0 = vld [vmem:[%s5092_s5 + $0xc0] sm:$0xff]  }
 0x19e   :  { %3288 = vmatprep.subr.bf16.mxu0 %v3827_v38 }
 0x1a0   :  { %2512 = vmatpush1.bf16.msra.mxu1 %v3777_v3 }
 0x1a1   :  { %2513 = vmatprep.subr.bf16.mxu1 %v3782_v4  ;;  %3289 = vmatpush3.bf16.msra.mxu0 %v3828_v39 }
 0x1a2   :  { %3290 = vmatprep.subr.bf16.mxu0 %v3829_v40 }
 0x1a4   :  { %2514 = vmatpush1.bf16.msra.mxu1 %v3780_v9  ;;  %v1731_v9 = vrot.slane %v1722_v2, %v236_v36  ;;  %v1739_v36 = vrot.slane %v1722_v2, %v244_v14  ;;  %v3247_v14 = vld [vmem:[%s5093_s6] ss:$0 sm:$0xff] }
 0x1a5   :  { %2515 = vmatprep.subr.bf16.mxu1 %v3785_v10  ;;  %3291 = vmatpush3.bf16.msra.mxu0 %v3830_v41 }
 0x1a6   :  { %3292 = vmatprep.subr.bf16.mxu0 %v3831_v42 }
 0x1a8   :  { %2516 = vmatpush1.bf16.msra.mxu1 %v3783_v12 }
 0x1a9   :  { %2517 = vmatprep.subr.bf16.mxu1 %v3788_v15  ;;  %3293 = vmatpush3.bf16.msra.mxu0 %v3832_v43 }
 0x1aa   :  { %3294 = vmatprep.subr.bf16.mxu0 %v3833_v44 }
 0x1ac   :  { %2518 = vmatpush1.bf16.msra.mxu1 %v3786_v16 }
 0x1ad   :  { %2519 = vmatprep.subr.bf16.mxu1 %v3791_v17  ;;  %3295 = vmatpush3.bf16.msra.mxu0 %v3834_v45 }
 0x1b0   :  { %2520 = vmatpush1.bf16.msra.mxu1 %v3789_v18 }
 0x1b1   :  { %2521 = vmatprep.subr.bf16.mxu1 %v3794_v19 }
 0x1b4   :  { %2522 = vmatpush1.bf16.msra.mxu1 %v3792_v20 }
 0x1b5   :  { %2523 = vmatprep.subr.bf16.mxu1 %v3797_v21 }
 0x1b8   :  { %2524 = vmatpush2.bf16.msra.mxu1 %v3795_v22 }
 0x1b9   :  { %2525 = vmatprep.subr.bf16.mxu1 %v3800_v23 }
 0x1bc   :  { %2526 = vmatpush2.bf16.msra.mxu1 %v3798_v24 }
 0x1bd   :  { %2527 = vmatprep.subr.bf16.mxu1 %v3803_v25 }
 0x1c0   :  { %2528 = vmatpush2.bf16.msra.mxu1 %v3801_v13 }
 0x1c1   :  { %2529 = vmatprep.subr.bf16.mxu1 %v3806_v26 }
 0x1c4   :  { %2530 = vmatpush2.bf16.msra.mxu1 %v3804_v27 }
 0x1c5   :  { %2531 = vmatprep.subr.bf16.mxu1 %v3809_v51 }
 0x1c8   :  { %2532 = vmatpush2.bf16.msra.mxu1 %v3807_v28 }
 0x1c9   :  { %2533 = vmatprep.subr.bf16.mxu1 %v3812_v29 }
 0x1cc   :  { %2534 = vmatpush2.bf16.msra.mxu1 %v3810_v30 }
 0x1cd   :  { %2535 = vmatprep.subr.bf16.mxu1 %v3815_v6 }
 0x1d0   :  { %2536 = vmatpush2.bf16.msra.mxu1 %v3813_v31 }
 0x1d1   :  { %2537 = vmatprep.subr.bf16.mxu1 %v3818_v32 }
 0x1d4   :  { %2538 = vmatpush2.bf16.msra.mxu1 %v3816_v37 }
 0x1d5   :  { %3302 = vmatprep.subr.bf16.mxu1 %v3835_v35 }
 0x1d7   :  { %2540 = vmatmul.mubr.bf16.vlgmr.msra.gmra.mxu1 %v4880_v59 }
 0x1d8   :  { %3303 = vmatpush3.bf16.msra.mxu1 %v3836_v46 }
 0x1d9   :  { %3304 = vmatprep.subr.bf16.mxu1 %v3837_v47 }
 0x1dc   :  { %3305 = vmatpush3.bf16.msra.mxu1 %v3838_v48 }
 0x1dd   :  { %3306 = vmatprep.subr.bf16.mxu1 %v3839_v49 }
 0x1e0   :  { %3307 = vmatpush3.bf16.msra.mxu1 %v3840_v50 }
 0x1e1   :  { %3308 = vmatprep.subr.bf16.mxu1 %v3841_v52 }
 0x1e4   :  { %3309 = vmatpush3.bf16.msra.mxu1 %v3842_v53 }
 0x1e5   :  { %3310 = vmatprep.subr.bf16.mxu1 %v3843_v54 }
 0x1e8   :  { %3311 = vmatpush3.bf16.msra.mxu1 %v3844_v55 }
 0x1e9   :  { %3312 = vmatprep.subr.bf16.mxu1 %v3845_v56 }
 0x1ec   :  { %3313 = vmatpush3.bf16.msra.mxu1 %v3846_v58 }
 0x1ed   :  { %3314 = vmatprep.subr.bf16.mxu1 %v3847_v62 }
 0x1f0   :  { %3315 = vmatpush3.bf16.msra.mxu1 %v3848_v63 }
 0x1f1   :  { %3316 = vmatprep.subr.bf16.mxu1 %v3849_v0 }
 0x1f4   :  { %3317 = vmatpush3.bf16.msra.mxu1 %v3850_v1 }
 0x20e   :  { %v2418_v59 = vpop.f32.mrf.mxu0 }
 0x20f   :  { %v2419_v11 = vadd.f32 %v2418_v59, %v1727_v5 }
 0x210   :  { %v2420_v60 = vpop.f32.mrf.mxu0 }
 0x211   :  { %v2421_v15 = vadd.f32 %v2420_v60, %v1731_v9 }
 0x212   :  { %v2422_v57 = vpop.f32.mrf.mxu0 }
 0x214   :  { %v2423_v61 = vpop.f32.mrf.mxu0 }
 0x24e   :  { %v2500_v3 = vpop.f32.mrf.mxu0 }
 0x24f   :  { %v2501_v25 = vadd.f32 %v2500_v3, %v1735_v33 }
 0x250   :  { %v2502_v4 = vpop.f32.mrf.mxu0 }
 0x251   :  { %v2503_v26 = vadd.f32 %v2502_v4, %v1739_v36 }
 0x252   :  { %v2504_v8 = vpop.f32.mrf.mxu0 }
 0x254   :  { %v2505_v10 = vpop.f32.mrf.mxu0 }
 0x257   :  { %v2459_v12 = vpop.f32.mrf.mxu1 }
 0x258   :  { %v2460_v16 = vadd.f32 %v2459_v12, %v2419_v11 }
 0x259   :  { %v2461_v17 = vpop.f32.mrf.mxu1 }
 0x25a   :  { %v2462_v18 = vadd.f32 %v2461_v17, %v2421_v15  ;;  %v2548_v19 = vmax.f32 %v2460_v16, 0.0 }
 0x25b   :  { %v2463_v20 = vpop.f32.mrf.mxu1 }
 0x25c   :  { %v2549_v21 = vmax.f32 %v2462_v18, 0.0  ;;  %v2552_v24 = vpack.c.bf16 %v2548_v19, %v2548_v19 }
 0x25d   :  { %v2464_v22 = vpop.f32.mrf.mxu1 }
 0x25e   :  { %v2553_v23 = vpack.c.bf16 %v2549_v21, %v2549_v21 }
 0x260   :  { %2851 = vmatprep.mubr.bf16.mxu0 %v2553_v23 }
 0x261   :  { %2852 = vmatmul.mubr.bf16.vlgmr.msra.gmra.mxu0 %v2552_v24 }
 0x297   :  { %v2541_v13 = vpop.f32.mrf.mxu1 }
 0x298   :  { %v2542_v27 = vadd.f32 %v2541_v13, %v2501_v25 }
 0x299   :  { %v2543_v51 = vpop.f32.mrf.mxu1 }
 0x29a   :  { %v2544_v28 = vadd.f32 %v2543_v51, %v2503_v26  ;;  %v2550_v29 = vmax.f32 %v2542_v27, 0.0 }
 0x29b   :  { %v2545_v30 = vpop.f32.mrf.mxu1 }
 0x29c   :  { %v2551_v6 = vmax.f32 %v2544_v28, 0.0  ;;  %v2554_v37 = vpack.c.bf16 %v2550_v29, %v2550_v29 }
 0x29d   :  { %v2546_v31 = vpop.f32.mrf.mxu1 }
 0x29e   :  { %v2555_v32 = vpack.c.bf16 %v2551_v6, %v2551_v6 }
 0x2a0   :  { %2891 = vmatprep.mubr.bf16.mxu1 %v2555_v32 }
 0x2a1   :  { %2892 = vmatmul.mubr.bf16.vlgmr.msra.gmra.mxu1 %v2554_v37 }
 0x321   :  { %v3296_v38 = vpop.f32.mrf.mxu0 }
 0x323   :  { %v3297_v39 = vpop.f32.mrf.mxu0 }
 0x324   :  { %v3298_v34 = vadd.f32 %v3297_v39, %v3296_v38 }
 0x325   :  { %v3299_v7 = vpop.f32.mrf.mxu0 }
 0x326   :  { %v2854_v43 = vadd.f32 %v3298_v34, %v3247_v14 }
 0x327   :  { %v3300_v40 = vpop.f32.mrf.mxu0 }
 0x361   :  { %v3318_v41 = vpop.f32.mrf.mxu1 }
 0x363   :  { %v3319_v42 = vpop.f32.mrf.mxu1 }
 0x364   :  { %v3320_v44 = vadd.f32 %v3319_v42, %v3318_v41 }
 0x365   :  { %v3321_v45 = vpop.f32.mrf.mxu1 }
 0x366   :  { %v2894_v35 = vadd.f32 %v3320_v44, %v2854_v43 }
 0x367   :  { %v3322_v46 = vpop.f32.mrf.mxu1 }
 0x368   :  { %2899 = vst [vmem:[#allocation2] sm:$0xff] %v2894_v35 }
 0x369   :  { %3863 = shalt.err (!%p3860_p4)
}
 0x36a   :  { %2909 = dma.vmem_to_hbm [thread:$0]  %s2907_s25, 128, %s5094_s7, [#allocation3]  }
 0x36b   :  { %3872 = dma.done.wait [#allocation3], 128  }
 0x36c   :  { %3873 = vsyncadd [#allocation3], 4294967168 }
 0x36d   :  { %2913 = vsyncpa [#allocation3], 1 }

</bundles_post_ra>
